<compile_context>
chip_gen: v7x
topology: tpu7x:2x2x1
jax: 0.10.0
libtpu: 0.0.40
codegen_flags: <defaults>
</compile_context>

<pallas_src>
import jax
import jax.numpy as jnp
from jax import lax
from jax.experimental import pallas as pl
from jax.experimental.pallas import tpu as pltpu


def _sigmoid(x):
    # tanh-form sigmoid: mathematically identical, single EUP op (no exp+div).
    return 0.5 * (jnp.tanh(0.5 * x) + 1.0)


def _full_spec(shape):
    """Whole-array VMEM block for a grid=() pallas_call."""
    zeros = (0,) * len(shape)
    return pl.BlockSpec(shape, lambda: zeros)


def _make_fused_lstm_kernel(n_layers, T, Bp, H, unroll):
    """Single kernel: all LSTM layers + final Linear(H->1), time loop inside.

    Ref order:
      x_ref (T*Bp, F)                              -- time-major, matmul dtype
      [wih_l (F_in,4H), whh_l (H,4H), b_l (1,4H)]  -- per layer
      fcw_ref (1, H), fcb_ref (1, 1)
      out_ref (Bp, 1)
      xw_sc   (T*Bp, 4H) f32  -- hoisted input projection of the current layer
      hseq_sc (T*Bp, H)  f32  -- hidden sequence feeding the next layer
    """

    def kernel(*refs):
        x_ref = refs[0]
        layer_refs = refs[1:1 + 3 * n_layers]
        fcw_ref = refs[1 + 3 * n_layers]
        fcb_ref = refs[2 + 3 * n_layers]
        out_ref = refs[3 + 3 * n_layers]
        xw_sc = refs[4 + 3 * n_layers]
        hseq_sc = refs[5 + 3 * n_layers]

        def gate_math(gates, c):
            # NOTE: for H >= 128 these slices are lane-aligned (multiples of
            # 128); for small H they are cheap sub-vreg selects on tiny data.
            i_g = _sigmoid(gates[:, 0 * H:1 * H])
            f_g = _sigmoid(gates[:, 1 * H:2 * H])
            g_g = jnp.tanh(gates[:, 2 * H:3 * H])
            o_g = _sigmoid(gates[:, 3 * H:4 * H])
            c_new = f_g * c + i_g * g_g
            h_new = o_g * jnp.tanh(c_new)
            return h_new, c_new

        def run_layer(layer_idx, inp2d):
            wih = layer_refs[3 * layer_idx][...]       # (F_in, 4H)
            whh = layer_refs[3 * layer_idx + 1][...]   # (H, 4H)
            bias = layer_refs[3 * layer_idx + 2][...]  # (1, 4H) = b_ih + b_hh

            # Hoisted input projection (+ folded bias): ONE MXU GEMM covering
            # every timestep -- the serial path only carries h @ W_hh.
            xw_sc[...] = (
                jnp.dot(inp2d.astype(wih.dtype), wih,
                        preferred_element_type=jnp.float32)
                + bias
            )

            # Last layer: only h_{T-1} is consumed (by the FC); skip seq write.
            write_seq = layer_idx < n_layers - 1

            # t = 0 peeled: h0 = c0 = 0  =>  no recurrent matmul, no f*c term.
            gates0 = xw_sc[pl.ds(0, Bp), :]
            i0 = _sigmoid(gates0[:, 0 * H:1 * H])
            g0 = jnp.tanh(gates0[:, 2 * H:3 * H])
            o0 = _sigmoid(gates0[:, 3 * H:4 * H])
            c_init = i0 * g0
            h_init = o0 * jnp.tanh(c_init)
            if write_seq:
                hseq_sc[pl.ds(0, Bp), :] = h_init

            def step(t, carry):
                h, c = carry
                row = pl.multiple_of(t * Bp, Bp)
                gates = xw_sc[pl.ds(row, Bp), :] + jnp.dot(
                    h.astype(whh.dtype), whh,
                    preferred_element_type=jnp.float32)
                h_new, c_new = gate_math(gates, c)
                if write_seq:
                    hseq_sc[pl.ds(row, Bp), :] = h_new
                return h_new, c_new

            h_last, _ = lax.fori_loop(1, T, step, (h_init, c_init),
                                      unroll=unroll)
            return h_last

        h_last = run_layer(0, x_ref[...])
        for l in range(1, n_layers):
            h_last = run_layer(l, hseq_sc[...])

        # Fused final Linear(H -> 1): VPU multiply + lane reduction (+ bias).
        out = (jnp.sum(h_last * fcw_ref[...], axis=-1, keepdims=True)
               + fcb_ref[...])
        out_ref[...] = out.astype(out_ref.dtype)

    return kernel


def lstm_model_forward(x_btf, params, matmul_dtype=jnp.bfloat16):
    """x_btf: (B, T, F) batch_first input (like PyTorch). Returns (B, 1) f32."""
    B, T, F = x_btf.shape
    L = len(params["lstm"])
    H = params["lstm"][0]["whh_t"].shape[0]
    Bp = ((B + 7) // 8) * 8                       # pad batch to f32 sublane count

    x = jnp.transpose(x_btf.astype(jnp.float32), (1, 0, 2))     # (T, B, F)
    if Bp != B:
        x = jnp.pad(x, ((0, 0), (0, Bp - B), (0, 0)))            # zero rows
    x2d = x.reshape(T * Bp, F).astype(matmul_dtype)              # time-major rows

    inputs = [x2d]
    in_specs = [_full_spec(x2d.shape)]
    for layer in params["lstm"]:
        wih = layer["wih_t"].astype(matmul_dtype)    # (F_in, 4H)
        whh = layer["whh_t"].astype(matmul_dtype)    # (H, 4H)
        b = layer["b"].astype(jnp.float32)           # (1, 4H)
        inputs += [wih, whh, b]
        in_specs += [_full_spec(wih.shape), _full_spec(whh.shape),
                     _full_spec(b.shape)]
    fcw = params["fc"]["w_row"].astype(jnp.float32)  # (1, H)
    fcb = params["fc"]["b"].astype(jnp.float32)      # (1, 1)
    inputs += [fcw, fcb]
    in_specs += [_full_spec(fcw.shape), _full_spec(fcb.shape)]

    # VMEM budget: inputs + output + scratch, generous headroom, clamped to the
    # v7x physical 64 MiB so the same code runs on v5e/v6e/v7x.
    footprint = sum(int(a.size) * a.dtype.itemsize for a in inputs)
    footprint += Bp * 1 * 4                                     # output
    footprint += T * Bp * 4 * H * 4 + T * Bp * H * 4            # scratches
    vmem_limit = int(min(max(2 * footprint + (4 << 20), 16 << 20), 64 << 20))

    # Fully unroll short recurrences (LLO scheduler visibility); partially
    # unroll long ones to keep compile time and code size bounded.
    unroll = True if T <= 32 else 8

    out_padded = pl.pallas_call(
        _make_fused_lstm_kernel(L, T, Bp, H, unroll),
        out_shape=jax.ShapeDtypeStruct((Bp, 1), jnp.float32),
        grid=(),                         # single invocation: recurrence in-kernel
        in_specs=in_specs,
        out_specs=_full_spec((Bp, 1)),
        scratch_shapes=[
            pltpu.VMEM((T * Bp, 4 * H), jnp.float32),  # hoisted input projection
            pltpu.VMEM((T * Bp, H), jnp.float32),      # inter-layer hidden sequence
        ],
        compiler_params=pltpu.CompilerParams(vmem_limit_bytes=vmem_limit),
    )(*inputs)
    return out_padded[:B]


def init_params(key, n_features, hidden_size, n_layers):
    """Deterministic init matching PyTorch param shapes (weights stored transposed)."""
    params = {"lstm": [], "fc": {}}
    bound = 1.0 / jnp.sqrt(hidden_size)
    for l in range(n_layers):
        in_size = n_features if l == 0 else hidden_size
        key, k1, k2, k3, k4 = jax.random.split(key, 5)
        w_ih = jax.random.uniform(k1, (4 * hidden_size, in_size),
                                  jnp.float32, -bound, bound)
        w_hh = jax.random.uniform(k2, (4 * hidden_size, hidden_size),
                                  jnp.float32, -bound, bound)
        b_ih = jax.random.uniform(k3, (4 * hidden_size,),
                                  jnp.float32, -bound, bound)
        b_hh = jax.random.uniform(k4, (4 * hidden_size,),
                                  jnp.float32, -bound, bound)
        params["lstm"].append({
            "wih_t": w_ih.T,                                   # (in, 4H)
            "whh_t": w_hh.T,                                   # (H, 4H)
            "b": (b_ih + b_hh).reshape(1, 4 * hidden_size),    # (1, 4H)
        })
    key, k5, k6 = jax.random.split(key, 3)
    w_fc = jax.random.uniform(k5, (1, hidden_size), jnp.float32, -bound, bound)
    b_fc = jax.random.uniform(k6, (1,), jnp.float32, -bound, bound)
    params["fc"]["w_row"] = w_fc                               # (1, H)
    params["fc"]["b"] = b_fc.reshape(1, 1)                     # (1, 1)
    return params


def _reference_forward(x_btf, params):
    """Pure-JAX reference matching PyTorch nn.LSTM + Linear semantics."""
    x = jnp.transpose(x_btf.astype(jnp.float32), (1, 0, 2))    # (T, B, F)
    T, B, _ = x.shape
    seq = x
    for layer in params["lstm"]:
        H = layer["whh_t"].shape[0]
        h = jnp.zeros((B, H), jnp.float32)
        c = jnp.zeros((B, H), jnp.float32)
        outs = []
        for t in range(T):
            g = seq[t] @ layer["wih_t"] + h @ layer["whh_t"] + layer["b"]
            i = jax.nn.sigmoid(g[:, 0 * H:1 * H])
            f = jax.nn.sigmoid(g[:, 1 * H:2 * H])
            gg = jnp.tanh(g[:, 2 * H:3 * H])
            o = jax.nn.sigmoid(g[:, 3 * H:4 * H])
            c = f * c + i * gg
            h = o * jnp.tanh(c)
            outs.append(h)
        seq = jnp.stack(outs, axis=0)
    return seq[-1] @ params["fc"]["w_row"].T + params["fc"]["b"]


if __name__ == "__main__":
    B, T, F, H, L = 2, 8, 4, 32, 2   # batch, seq, n_features, hidden, n_layers

    key = jax.random.PRNGKey(0)
    key, xkey = jax.random.split(key)
    x = jax.random.normal(xkey, (B, T, F), jnp.float32)
    params = init_params(key, n_features=F, hidden_size=H, n_layers=L)

    fwd = jax.jit(lstm_model_forward, static_argnames=("matmul_dtype",))
    out = fwd(x, params)
    out = jax.block_until_ready(out)
    assert out.shape == (B, 1), out.shape

    # Sanity check vs. a pure-JAX reference (loose tol: bf16 MXU operands).
    ref = _reference_forward(x, params)
    err = float(jnp.max(jnp.abs(out - ref)))
    assert err < 5e-2, f"mismatch vs reference: max abs err = {err}"

    print("KERNEL_OK")
</pallas_src>

<mosaic_0001>
module attributes {stable_mosaic.version = 11 : i64} {
  func.func @kernel(%arg0: memref<64x4xbf16, #tpu.memory_space<vmem>>, %arg1: memref<4x128xbf16, #tpu.memory_space<vmem>>, %arg2: memref<32x128xbf16, #tpu.memory_space<vmem>>, %arg3: memref<1x128xf32, #tpu.memory_space<vmem>>, %arg4: memref<32x128xbf16, #tpu.memory_space<vmem>>, %arg5: memref<32x128xbf16, #tpu.memory_space<vmem>>, %arg6: memref<1x128xf32, #tpu.memory_space<vmem>>, %arg7: memref<1x32xf32, #tpu.memory_space<vmem>>, %arg8: memref<1x1xf32, #tpu.memory_space<vmem>>, %arg9: memref<8x1xf32, #tpu.memory_space<vmem>>, %arg10: memref<64x128xf32, #tpu.memory_space<vmem>>, %arg11: memref<64x32xf32, #tpu.memory_space<vmem>>) attributes {dimension_semantics = [], scalar_prefetch = 0 : i64, scratch_operands = 2 : i64, tpu.core_type = #tpu.core_type<tc>} {
    %c0 = arith.constant 0 : index
    %c0_0 = arith.constant 0 : index
    %0 = vector.load %arg0[%c0, %c0_0] : memref<64x4xbf16, #tpu.memory_space<vmem>>, vector<64x4xbf16>
    %c0_1 = arith.constant 0 : index
    %c0_2 = arith.constant 0 : index
    %1 = vector.load %arg1[%c0_1, %c0_2] : memref<4x128xbf16, #tpu.memory_space<vmem>>, vector<4x128xbf16>
    %c0_3 = arith.constant 0 : index
    %c0_4 = arith.constant 0 : index
    %2 = vector.load %arg2[%c0_3, %c0_4] : memref<32x128xbf16, #tpu.memory_space<vmem>>, vector<32x128xbf16>
    %c0_5 = arith.constant 0 : index
    %c0_6 = arith.constant 0 : index
    %3 = vector.load %arg3[%c0_5, %c0_6] : memref<1x128xf32, #tpu.memory_space<vmem>>, vector<1x128xf32>
    %cst = arith.constant dense<0.000000e+00> : vector<64x128xf32>
    %4 = tpu.matmul %0, %1, %cst {dimension_numbers = #tpu.dot_dimension_numbers<[1], [0], [0], [1], [0, 0, 1, 1], [], []>} : vector<64x4xbf16>, vector<4x128xbf16>, vector<64x128xf32> -> vector<64x128xf32>
    %5 = vector.broadcast %3 : vector<1x128xf32> to vector<64x128xf32>
    %6 = arith.addf %4, %5 : vector<64x128xf32>
    %c0_7 = arith.constant 0 : index
    %c0_8 = arith.constant 0 : index
    %7 = vector.load %arg10[%c0_7, %c0_8] : memref<64x128xf32, #tpu.memory_space<vmem>>, vector<64x128xf32>
    tpu.vector_store %arg10[%c0_7, %c0_8], %6 {strides = array<i32>} : memref<64x128xf32, #tpu.memory_space<vmem>>, vector<64x128xf32>,
    %c0_9 = arith.constant 0 : index
    %c0_10 = arith.constant 0 : index
    %8 = vector.load %arg10[%c0_9, %c0_10] : memref<64x128xf32, #tpu.memory_space<vmem>>, vector<8x128xf32>
    %9 = vector.extract_strided_slice %8 {offsets = [0, 0], sizes = [8, 32], strides = [1, 1]} : vector<8x128xf32> to vector<8x32xf32>
    %cst_11 = arith.constant 5.000000e-01 : f32
    %10 = vector.broadcast %cst_11 : f32 to vector<8x32xf32>
    %11 = arith.mulf %10, %9 : vector<8x32xf32>
    %12 = math.tanh %11 : vector<8x32xf32>
    %cst_12 = arith.constant 1.000000e+00 : f32
    %13 = vector.broadcast %cst_12 : f32 to vector<8x32xf32>
    %14 = arith.addf %12, %13 : vector<8x32xf32>
    %cst_13 = arith.constant 5.000000e-01 : f32
    %15 = vector.broadcast %cst_13 : f32 to vector<8x32xf32>
    %16 = arith.mulf %15, %14 : vector<8x32xf32>
    %17 = vector.extract_strided_slice %8 {offsets = [0, 64], sizes = [8, 32], strides = [1, 1]} : vector<8x128xf32> to vector<8x32xf32>
    %18 = math.tanh %17 : vector<8x32xf32>
    %19 = vector.extract_strided_slice %8 {offsets = [0, 96], sizes = [8, 32], strides = [1, 1]} : vector<8x128xf32> to vector<8x32xf32>
    %cst_14 = arith.constant 5.000000e-01 : f32
    %20 = vector.broadcast %cst_14 : f32 to vector<8x32xf32>
    %21 = arith.mulf %20, %19 : vector<8x32xf32>
    %22 = math.tanh %21 : vector<8x32xf32>
    %cst_15 = arith.constant 1.000000e+00 : f32
    %23 = vector.broadcast %cst_15 : f32 to vector<8x32xf32>
    %24 = arith.addf %22, %23 : vector<8x32xf32>
    %cst_16 = arith.constant 5.000000e-01 : f32
    %25 = vector.broadcast %cst_16 : f32 to vector<8x32xf32>
    %26 = arith.mulf %25, %24 : vector<8x32xf32>
    %27 = arith.mulf %16, %18 : vector<8x32xf32>
    %28 = math.tanh %27 : vector<8x32xf32>
    %29 = arith.mulf %26, %28 : vector<8x32xf32>
    %c0_17 = arith.constant 0 : index
    %c0_18 = arith.constant 0 : index
    %30 = vector.load %arg11[%c0_17, %c0_18] : memref<64x32xf32, #tpu.memory_space<vmem>>, vector<8x32xf32>
    tpu.vector_store %arg11[%c0_17, %c0_18], %29 {strides = array<i32>} : memref<64x32xf32, #tpu.memory_space<vmem>>, vector<8x32xf32>,
    %c1_i32 = arith.constant 1 : i32
    %c8_i32 = arith.constant 8 : i32
    %31 = arith.muli %c1_i32, %c8_i32 : i32
    %32 = tpu.assume_multiple %31, 8 : i32
    %33 = arith.index_cast %32 : i32 to index
    %c0_19 = arith.constant 0 : index
    %34 = vector.load %arg10[%33, %c0_19] : memref<64x128xf32, #tpu.memory_space<vmem>>, vector<8x128xf32>
    %35 = arith.truncf %29 : vector<8x32xf32> to vector<8x32xbf16>
    %cst_20 = arith.constant dense<0.000000e+00> : vector<8x128xf32>
    %36 = tpu.matmul %35, %2, %cst_20 {dimension_numbers = #tpu.dot_dimension_numbers<[1], [0], [0], [1], [0, 0, 1, 1], [], []>} : vector<8x32xbf16>, vector<32x128xbf16>, vector<8x128xf32> -> vector<8x128xf32>
    %37 = arith.addf %34, %36 : vector<8x128xf32>
    %38 = vector.extract_strided_slice %37 {offsets = [0, 0], sizes = [8, 32], strides = [1, 1]} : vector<8x128xf32> to vector<8x32xf32>
    %cst_21 = arith.constant 5.000000e-01 : f32
    %39 = vector.broadcast %cst_21 : f32 to vector<8x32xf32>
    %40 = arith.mulf %39, %38 : vector<8x32xf32>
    %41 = math.tanh %40 : vector<8x32xf32>
    %cst_22 = arith.constant 1.000000e+00 : f32
    %42 = vector.broadcast %cst_22 : f32 to vector<8x32xf32>
    %43 = arith.addf %41, %42 : vector<8x32xf32>
    %cst_23 = arith.constant 5.000000e-01 : f32
    %44 = vector.broadcast %cst_23 : f32 to vector<8x32xf32>
    %45 = arith.mulf %44, %43 : vector<8x32xf32>
    %46 = vector.extract_strided_slice %37 {offsets = [0, 32], sizes = [8, 32], strides = [1, 1]} : vector<8x128xf32> to vector<8x32xf32>
    %cst_24 = arith.constant 5.000000e-01 : f32
    %47 = vector.broadcast %cst_24 : f32 to vector<8x32xf32>
    %48 = arith.mulf %47, %46 : vector<8x32xf32>
    %49 = math.tanh %48 : vector<8x32xf32>
    %cst_25 = arith.constant 1.000000e+00 : f32
    %50 = vector.broadcast %cst_25 : f32 to vector<8x32xf32>
    %51 = arith.addf %49, %50 : vector<8x32xf32>
    %cst_26 = arith.constant 5.000000e-01 : f32
    %52 = vector.broadcast %cst_26 : f32 to vector<8x32xf32>
    %53 = arith.mulf %52, %51 : vector<8x32xf32>
    %54 = vector.extract_strided_slice %37 {offsets = [0, 64], sizes = [8, 32], strides = [1, 1]} : vector<8x128xf32> to vector<8x32xf32>
    %55 = math.tanh %54 : vector<8x32xf32>
    %56 = vector.extract_strided_slice %37 {offsets = [0, 96], sizes = [8, 32], strides = [1, 1]} : vector<8x128xf32> to vector<8x32xf32>
    %cst_27 = arith.constant 5.000000e-01 : f32
    %57 = vector.broadcast %cst_27 : f32 to vector<8x32xf32>
    %58 = arith.mulf %57, %56 : vector<8x32xf32>
    %59 = math.tanh %58 : vector<8x32xf32>
    %cst_28 = arith.constant 1.000000e+00 : f32
    %60 = vector.broadcast %cst_28 : f32 to vector<8x32xf32>
    %61 = arith.addf %59, %60 : vector<8x32xf32>
    %cst_29 = arith.constant 5.000000e-01 : f32
    %62 = vector.broadcast %cst_29 : f32 to vector<8x32xf32>
    %63 = arith.mulf %62, %61 : vector<8x32xf32>
    %64 = arith.mulf %53, %27 : vector<8x32xf32>
    %65 = arith.mulf %45, %55 : vector<8x32xf32>
    %66 = arith.addf %64, %65 : vector<8x32xf32>
    %67 = math.tanh %66 : vector<8x32xf32>
    %68 = arith.mulf %63, %67 : vector<8x32xf32>
    %69 = arith.index_cast %32 : i32 to index
    %c0_30 = arith.constant 0 : index
    %70 = vector.load %arg11[%69, %c0_30] : memref<64x32xf32, #tpu.memory_space<vmem>>, vector<8x32xf32>
    tpu.vector_store %arg11[%69, %c0_30], %68 {strides = array<i32>} : memref<64x32xf32, #tpu.memory_space<vmem>>, vector<8x32xf32>,
    %c2_i32 = arith.constant 2 : i32
    %c8_i32_31 = arith.constant 8 : i32
    %71 = arith.muli %c2_i32, %c8_i32_31 : i32
    %72 = tpu.assume_multiple %71, 8 : i32
    %73 = arith.index_cast %72 : i32 to index
    %c0_32 = arith.constant 0 : index
    %74 = vector.load %arg10[%73, %c0_32] : memref<64x128xf32, #tpu.memory_space<vmem>>, vector<8x128xf32>
    %75 = arith.truncf %68 : vector<8x32xf32> to vector<8x32xbf16>
    %cst_33 = arith.constant dense<0.000000e+00> : vector<8x128xf32>
    %76 = tpu.matmul %75, %2, %cst_33 {dimension_numbers = #tpu.dot_dimension_numbers<[1], [0], [0], [1], [0, 0, 1, 1], [], []>} : vector<8x32xbf16>, vector<32x128xbf16>, vector<8x128xf32> -> vector<8x128xf32>
    %77 = arith.addf %74, %76 : vector<8x128xf32>
    %78 = vector.extract_strided_slice %77 {offsets = [0, 0], sizes = [8, 32], strides = [1, 1]} : vector<8x128xf32> to vector<8x32xf32>
    %cst_34 = arith.constant 5.000000e-01 : f32
    %79 = vector.broadcast %cst_34 : f32 to vector<8x32xf32>
    %80 = arith.mulf %79, %78 : vector<8x32xf32>
    %81 = math.tanh %80 : vector<8x32xf32>
    %cst_35 = arith.constant 1.000000e+00 : f32
    %82 = vector.broadcast %cst_35 : f32 to vector<8x32xf32>
    %83 = arith.addf %81, %82 : vector<8x32xf32>
    %cst_36 = arith.constant 5.000000e-01 : f32
    %84 = vector.broadcast %cst_36 : f32 to vector<8x32xf32>
    %85 = arith.mulf %84, %83 : vector<8x32xf32>
    %86 = vector.extract_strided_slice %77 {offsets = [0, 32], sizes = [8, 32], strides = [1, 1]} : vector<8x128xf32> to vector<8x32xf32>
    %cst_37 = arith.constant 5.000000e-01 : f32
    %87 = vector.broadcast %cst_37 : f32 to vector<8x32xf32>
    %88 = arith.mulf %87, %86 : vector<8x32xf32>
    %89 = math.tanh %88 : vector<8x32xf32>
    %cst_38 = arith.constant 1.000000e+00 : f32
    %90 = vector.broadcast %cst_38 : f32 to vector<8x32xf32>
    %91 = arith.addf %89, %90 : vector<8x32xf32>
    %cst_39 = arith.constant 5.000000e-01 : f32
    %92 = vector.broadcast %cst_39 : f32 to vector<8x32xf32>
    %93 = arith.mulf %92, %91 : vector<8x32xf32>
    %94 = vector.extract_strided_slice %77 {offsets = [0, 64], sizes = [8, 32], strides = [1, 1]} : vector<8x128xf32> to vector<8x32xf32>
    %95 = math.tanh %94 : vector<8x32xf32>
    %96 = vector.extract_strided_slice %77 {offsets = [0, 96], sizes = [8, 32], strides = [1, 1]} : vector<8x128xf32> to vector<8x32xf32>
    %cst_40 = arith.constant 5.000000e-01 : f32
    %97 = vector.broadcast %cst_40 : f32 to vector<8x32xf32>
    %98 = arith.mulf %97, %96 : vector<8x32xf32>
    %99 = math.tanh %98 : vector<8x32xf32>
    %cst_41 = arith.constant 1.000000e+00 : f32
    %100 = vector.broadcast %cst_41 : f32 to vector<8x32xf32>
    %101 = arith.addf %99, %100 : vector<8x32xf32>
    %cst_42 = arith.constant 5.000000e-01 : f32
    %102 = vector.broadcast %cst_42 : f32 to vector<8x32xf32>
    %103 = arith.mulf %102, %101 : vector<8x32xf32>
    %104 = arith.mulf %93, %66 : vector<8x32xf32>
    %105 = arith.mulf %85, %95 : vector<8x32xf32>
    %106 = arith.addf %104, %105 : vector<8x32xf32>
    %107 = math.tanh %106 : vector<8x32xf32>
    %108 = arith.mulf %103, %107 : vector<8x32xf32>
    %109 = arith.index_cast %72 : i32 to index
    %c0_43 = arith.constant 0 : index
    %110 = vector.load %arg11[%109, %c0_43] : memref<64x32xf32, #tpu.memory_space<vmem>>, vector<8x32xf32>
    tpu.vector_store %arg11[%109, %c0_43], %108 {strides = array<i32>} : memref<64x32xf32, #tpu.memory_space<vmem>>, vector<8x32xf32>,
    %c3_i32 = arith.constant 3 : i32
    %c8_i32_44 = arith.constant 8 : i32
    %111 = arith.muli %c3_i32, %c8_i32_44 : i32
    %112 = tpu.assume_multiple %111, 8 : i32
    %113 = arith.index_cast %112 : i32 to index
    %c0_45 = arith.constant 0 : index
    %114 = vector.load %arg10[%113, %c0_45] : memref<64x128xf32, #tpu.memory_space<vmem>>, vector<8x128xf32>
    %115 = arith.truncf %108 : vector<8x32xf32> to vector<8x32xbf16>
    %cst_46 = arith.constant dense<0.000000e+00> : vector<8x128xf32>
    %116 = tpu.matmul %115, %2, %cst_46 {dimension_numbers = #tpu.dot_dimension_numbers<[1], [0], [0], [1], [0, 0, 1, 1], [], []>} : vector<8x32xbf16>, vector<32x128xbf16>, vector<8x128xf32> -> vector<8x128xf32>
    %117 = arith.addf %114, %116 : vector<8x128xf32>
    %118 = vector.extract_strided_slice %117 {offsets = [0, 0], sizes = [8, 32], strides = [1, 1]} : vector<8x128xf32> to vector<8x32xf32>
    %cst_47 = arith.constant 5.000000e-01 : f32
    %119 = vector.broadcast %cst_47 : f32 to vector<8x32xf32>
    %120 = arith.mulf %119, %118 : vector<8x32xf32>
    %121 = math.tanh %120 : vector<8x32xf32>
    %cst_48 = arith.constant 1.000000e+00 : f32
    %122 = vector.broadcast %cst_48 : f32 to vector<8x32xf32>
    %123 = arith.addf %121, %122 : vector<8x32xf32>
    %cst_49 = arith.constant 5.000000e-01 : f32
    %124 = vector.broadcast %cst_49 : f32 to vector<8x32xf32>
    %125 = arith.mulf %124, %123 : vector<8x32xf32>
    %126 = vector.extract_strided_slice %117 {offsets = [0, 32], sizes = [8, 32], strides = [1, 1]} : vector<8x128xf32> to vector<8x32xf32>
    %cst_50 = arith.constant 5.000000e-01 : f32
    %127 = vector.broadcast %cst_50 : f32 to vector<8x32xf32>
    %128 = arith.mulf %127, %126 : vector<8x32xf32>
    %129 = math.tanh %128 : vector<8x32xf32>
    %cst_51 = arith.constant 1.000000e+00 : f32
    %130 = vector.broadcast %cst_51 : f32 to vector<8x32xf32>
    %131 = arith.addf %129, %130 : vector<8x32xf32>
    %cst_52 = arith.constant 5.000000e-01 : f32
    %132 = vector.broadcast %cst_52 : f32 to vector<8x32xf32>
    %133 = arith.mulf %132, %131 : vector<8x32xf32>
    %134 = vector.extract_strided_slice %117 {offsets = [0, 64], sizes = [8, 32], strides = [1, 1]} : vector<8x128xf32> to vector<8x32xf32>
    %135 = math.tanh %134 : vector<8x32xf32>
    %136 = vector.extract_strided_slice %117 {offsets = [0, 96], sizes = [8, 32], strides = [1, 1]} : vector<8x128xf32> to vector<8x32xf32>
    %cst_53 = arith.constant 5.000000e-01 : f32
    %137 = vector.broadcast %cst_53 : f32 to vector<8x32xf32>
    %138 = arith.mulf %137, %136 : vector<8x32xf32>
    %139 = math.tanh %138 : vector<8x32xf32>
    %cst_54 = arith.constant 1.000000e+00 : f32
    %140 = vector.broadcast %cst_54 : f32 to vector<8x32xf32>
    %141 = arith.addf %139, %140 : vector<8x32xf32>
    %cst_55 = arith.constant 5.000000e-01 : f32
    %142 = vector.broadcast %cst_55 : f32 to vector<8x32xf32>
    %143 = arith.mulf %142, %141 : vector<8x32xf32>
    %144 = arith.mulf %133, %106 : vector<8x32xf32>
    %145 = arith.mulf %125, %135 : vector<8x32xf32>
    %146 = arith.addf %144, %145 : vector<8x32xf32>
    %147 = math.tanh %146 : vector<8x32xf32>
    %148 = arith.mulf %143, %147 : vector<8x32xf32>
    %149 = arith.index_cast %112 : i32 to index
    %c0_56 = arith.constant 0 : index
    %150 = vector.load %arg11[%149, %c0_56] : memref<64x32xf32, #tpu.memory_space<vmem>>, vector<8x32xf32>
    tpu.vector_store %arg11[%149, %c0_56], %148 {strides = array<i32>} : memref<64x32xf32, #tpu.memory_space<vmem>>, vector<8x32xf32>,
    %c4_i32 = arith.constant 4 : i32
    %c8_i32_57 = arith.constant 8 : i32
    %151 = arith.muli %c4_i32, %c8_i32_57 : i32
    %152 = tpu.assume_multiple %151, 8 : i32
    %153 = arith.index_cast %152 : i32 to index
    %c0_58 = arith.constant 0 : index
    %154 = vector.load %arg10[%153, %c0_58] : memref<64x128xf32, #tpu.memory_space<vmem>>, vector<8x128xf32>
    %155 = arith.truncf %148 : vector<8x32xf32> to vector<8x32xbf16>
    %cst_59 = arith.constant dense<0.000000e+00> : vector<8x128xf32>
    %156 = tpu.matmul %155, %2, %cst_59 {dimension_numbers = #tpu.dot_dimension_numbers<[1], [0], [0], [1], [0, 0, 1, 1], [], []>} : vector<8x32xbf16>, vector<32x128xbf16>, vector<8x128xf32> -> vector<8x128xf32>
    %157 = arith.addf %154, %156 : vector<8x128xf32>
    %158 = vector.extract_strided_slice %157 {offsets = [0, 0], sizes = [8, 32], strides = [1, 1]} : vector<8x128xf32> to vector<8x32xf32>
    %cst_60 = arith.constant 5.000000e-01 : f32
    %159 = vector.broadcast %cst_60 : f32 to vector<8x32xf32>
    %160 = arith.mulf %159, %158 : vector<8x32xf32>
    %161 = math.tanh %160 : vector<8x32xf32>
    %cst_61 = arith.constant 1.000000e+00 : f32
    %162 = vector.broadcast %cst_61 : f32 to vector<8x32xf32>
    %163 = arith.addf %161, %162 : vector<8x32xf32>
    %cst_62 = arith.constant 5.000000e-01 : f32
    %164 = vector.broadcast %cst_62 : f32 to vector<8x32xf32>
    %165 = arith.mulf %164, %163 : vector<8x32xf32>
    %166 = vector.extract_strided_slice %157 {offsets = [0, 32], sizes = [8, 32], strides = [1, 1]} : vector<8x128xf32> to vector<8x32xf32>
    %cst_63 = arith.constant 5.000000e-01 : f32
    %167 = vector.broadcast %cst_63 : f32 to vector<8x32xf32>
    %168 = arith.mulf %167, %166 : vector<8x32xf32>
    %169 = math.tanh %168 : vector<8x32xf32>
    %cst_64 = arith.constant 1.000000e+00 : f32
    %170 = vector.broadcast %cst_64 : f32 to vector<8x32xf32>
    %171 = arith.addf %169, %170 : vector<8x32xf32>
    %cst_65 = arith.constant 5.000000e-01 : f32
    %172 = vector.broadcast %cst_65 : f32 to vector<8x32xf32>
    %173 = arith.mulf %172, %171 : vector<8x32xf32>
    %174 = vector.extract_strided_slice %157 {offsets = [0, 64], sizes = [8, 32], strides = [1, 1]} : vector<8x128xf32> to vector<8x32xf32>
    %175 = math.tanh %174 : vector<8x32xf32>
    %176 = vector.extract_strided_slice %157 {offsets = [0, 96], sizes = [8, 32], strides = [1, 1]} : vector<8x128xf32> to vector<8x32xf32>
    %cst_66 = arith.constant 5.000000e-01 : f32
    %177 = vector.broadcast %cst_66 : f32 to vector<8x32xf32>
    %178 = arith.mulf %177, %176 : vector<8x32xf32>
    %179 = math.tanh %178 : vector<8x32xf32>
    %cst_67 = arith.constant 1.000000e+00 : f32
    %180 = vector.broadcast %cst_67 : f32 to vector<8x32xf32>
    %181 = arith.addf %179, %180 : vector<8x32xf32>
    %cst_68 = arith.constant 5.000000e-01 : f32
    %182 = vector.broadcast %cst_68 : f32 to vector<8x32xf32>
    %183 = arith.mulf %182, %181 : vector<8x32xf32>
    %184 = arith.mulf %173, %146 : vector<8x32xf32>
    %185 = arith.mulf %165, %175 : vector<8x32xf32>
    %186 = arith.addf %184, %185 : vector<8x32xf32>
    %187 = math.tanh %186 : vector<8x32xf32>
    %188 = arith.mulf %183, %187 : vector<8x32xf32>
    %189 = arith.index_cast %152 : i32 to index
    %c0_69 = arith.constant 0 : index
    %190 = vector.load %arg11[%189, %c0_69] : memref<64x32xf32, #tpu.memory_space<vmem>>, vector<8x32xf32>
    tpu.vector_store %arg11[%189, %c0_69], %188 {strides = array<i32>} : memref<64x32xf32, #tpu.memory_space<vmem>>, vector<8x32xf32>,
    %c5_i32 = arith.constant 5 : i32
    %c8_i32_70 = arith.constant 8 : i32
    %191 = arith.muli %c5_i32, %c8_i32_70 : i32
    %192 = tpu.assume_multiple %191, 8 : i32
    %193 = arith.index_cast %192 : i32 to index
    %c0_71 = arith.constant 0 : index
    %194 = vector.load %arg10[%193, %c0_71] : memref<64x128xf32, #tpu.memory_space<vmem>>, vector<8x128xf32>
    %195 = arith.truncf %188 : vector<8x32xf32> to vector<8x32xbf16>
    %cst_72 = arith.constant dense<0.000000e+00> : vector<8x128xf32>
    %196 = tpu.matmul %195, %2, %cst_72 {dimension_numbers = #tpu.dot_dimension_numbers<[1], [0], [0], [1], [0, 0, 1, 1], [], []>} : vector<8x32xbf16>, vector<32x128xbf16>, vector<8x128xf32> -> vector<8x128xf32>
    %197 = arith.addf %194, %196 : vector<8x128xf32>
    %198 = vector.extract_strided_slice %197 {offsets = [0, 0], sizes = [8, 32], strides = [1, 1]} : vector<8x128xf32> to vector<8x32xf32>
    %cst_73 = arith.constant 5.000000e-01 : f32
    %199 = vector.broadcast %cst_73 : f32 to vector<8x32xf32>
    %200 = arith.mulf %199, %198 : vector<8x32xf32>
    %201 = math.tanh %200 : vector<8x32xf32>
    %cst_74 = arith.constant 1.000000e+00 : f32
    %202 = vector.broadcast %cst_74 : f32 to vector<8x32xf32>
    %203 = arith.addf %201, %202 : vector<8x32xf32>
    %cst_75 = arith.constant 5.000000e-01 : f32
    %204 = vector.broadcast %cst_75 : f32 to vector<8x32xf32>
    %205 = arith.mulf %204, %203 : vector<8x32xf32>
    %206 = vector.extract_strided_slice %197 {offsets = [0, 32], sizes = [8, 32], strides = [1, 1]} : vector<8x128xf32> to vector<8x32xf32>
    %cst_76 = arith.constant 5.000000e-01 : f32
    %207 = vector.broadcast %cst_76 : f32 to vector<8x32xf32>
    %208 = arith.mulf %207, %206 : vector<8x32xf32>
    %209 = math.tanh %208 : vector<8x32xf32>
    %cst_77 = arith.constant 1.000000e+00 : f32
    %210 = vector.broadcast %cst_77 : f32 to vector<8x32xf32>
    %211 = arith.addf %209, %210 : vector<8x32xf32>
    %cst_78 = arith.constant 5.000000e-01 : f32
    %212 = vector.broadcast %cst_78 : f32 to vector<8x32xf32>
    %213 = arith.mulf %212, %211 : vector<8x32xf32>
    %214 = vector.extract_strided_slice %197 {offsets = [0, 64], sizes = [8, 32], strides = [1, 1]} : vector<8x128xf32> to vector<8x32xf32>
    %215 = math.tanh %214 : vector<8x32xf32>
    %216 = vector.extract_strided_slice %197 {offsets = [0, 96], sizes = [8, 32], strides = [1, 1]} : vector<8x128xf32> to vector<8x32xf32>
    %cst_79 = arith.constant 5.000000e-01 : f32
    %217 = vector.broadcast %cst_79 : f32 to vector<8x32xf32>
    %218 = arith.mulf %217, %216 : vector<8x32xf32>
    %219 = math.tanh %218 : vector<8x32xf32>
    %cst_80 = arith.constant 1.000000e+00 : f32
    %220 = vector.broadcast %cst_80 : f32 to vector<8x32xf32>
    %221 = arith.addf %219, %220 : vector<8x32xf32>
    %cst_81 = arith.constant 5.000000e-01 : f32
    %222 = vector.broadcast %cst_81 : f32 to vector<8x32xf32>
    %223 = arith.mulf %222, %221 : vector<8x32xf32>
    %224 = arith.mulf %213, %186 : vector<8x32xf32>
    %225 = arith.mulf %205, %215 : vector<8x32xf32>
    %226 = arith.addf %224, %225 : vector<8x32xf32>
    %227 = math.tanh %226 : vector<8x32xf32>
    %228 = arith.mulf %223, %227 : vector<8x32xf32>
    %229 = arith.index_cast %192 : i32 to index
    %c0_82 = arith.constant 0 : index
    %230 = vector.load %arg11[%229, %c0_82] : memref<64x32xf32, #tpu.memory_space<vmem>>, vector<8x32xf32>
    tpu.vector_store %arg11[%229, %c0_82], %228 {strides = array<i32>} : memref<64x32xf32, #tpu.memory_space<vmem>>, vector<8x32xf32>,
    %c6_i32 = arith.constant 6 : i32
    %c8_i32_83 = arith.constant 8 : i32
    %231 = arith.muli %c6_i32, %c8_i32_83 : i32
    %232 = tpu.assume_multiple %231, 8 : i32
    %233 = arith.index_cast %232 : i32 to index
    %c0_84 = arith.constant 0 : index
    %234 = vector.load %arg10[%233, %c0_84] : memref<64x128xf32, #tpu.memory_space<vmem>>, vector<8x128xf32>
    %235 = arith.truncf %228 : vector<8x32xf32> to vector<8x32xbf16>
    %cst_85 = arith.constant dense<0.000000e+00> : vector<8x128xf32>
    %236 = tpu.matmul %235, %2, %cst_85 {dimension_numbers = #tpu.dot_dimension_numbers<[1], [0], [0], [1], [0, 0, 1, 1], [], []>} : vector<8x32xbf16>, vector<32x128xbf16>, vector<8x128xf32> -> vector<8x128xf32>
    %237 = arith.addf %234, %236 : vector<8x128xf32>
    %238 = vector.extract_strided_slice %237 {offsets = [0, 0], sizes = [8, 32], strides = [1, 1]} : vector<8x128xf32> to vector<8x32xf32>
    %cst_86 = arith.constant 5.000000e-01 : f32
    %239 = vector.broadcast %cst_86 : f32 to vector<8x32xf32>
    %240 = arith.mulf %239, %238 : vector<8x32xf32>
    %241 = math.tanh %240 : vector<8x32xf32>
    %cst_87 = arith.constant 1.000000e+00 : f32
    %242 = vector.broadcast %cst_87 : f32 to vector<8x32xf32>
    %243 = arith.addf %241, %242 : vector<8x32xf32>
    %cst_88 = arith.constant 5.000000e-01 : f32
    %244 = vector.broadcast %cst_88 : f32 to vector<8x32xf32>
    %245 = arith.mulf %244, %243 : vector<8x32xf32>
    %246 = vector.extract_strided_slice %237 {offsets = [0, 32], sizes = [8, 32], strides = [1, 1]} : vector<8x128xf32> to vector<8x32xf32>
    %cst_89 = arith.constant 5.000000e-01 : f32
    %247 = vector.broadcast %cst_89 : f32 to vector<8x32xf32>
    %248 = arith.mulf %247, %246 : vector<8x32xf32>
    %249 = math.tanh %248 : vector<8x32xf32>
    %cst_90 = arith.constant 1.000000e+00 : f32
    %250 = vector.broadcast %cst_90 : f32 to vector<8x32xf32>
    %251 = arith.addf %249, %250 : vector<8x32xf32>
    %cst_91 = arith.constant 5.000000e-01 : f32
    %252 = vector.broadcast %cst_91 : f32 to vector<8x32xf32>
    %253 = arith.mulf %252, %251 : vector<8x32xf32>
    %254 = vector.extract_strided_slice %237 {offsets = [0, 64], sizes = [8, 32], strides = [1, 1]} : vector<8x128xf32> to vector<8x32xf32>
    %255 = math.tanh %254 : vector<8x32xf32>
    %256 = vector.extract_strided_slice %237 {offsets = [0, 96], sizes = [8, 32], strides = [1, 1]} : vector<8x128xf32> to vector<8x32xf32>
    %cst_92 = arith.constant 5.000000e-01 : f32
    %257 = vector.broadcast %cst_92 : f32 to vector<8x32xf32>
    %258 = arith.mulf %257, %256 : vector<8x32xf32>
    %259 = math.tanh %258 : vector<8x32xf32>
    %cst_93 = arith.constant 1.000000e+00 : f32
    %260 = vector.broadcast %cst_93 : f32 to vector<8x32xf32>
    %261 = arith.addf %259, %260 : vector<8x32xf32>
    %cst_94 = arith.constant 5.000000e-01 : f32
    %262 = vector.broadcast %cst_94 : f32 to vector<8x32xf32>
    %263 = arith.mulf %262, %261 : vector<8x32xf32>
    %264 = arith.mulf %253, %226 : vector<8x32xf32>
    %265 = arith.mulf %245, %255 : vector<8x32xf32>
    %266 = arith.addf %264, %265 : vector<8x32xf32>
    %267 = math.tanh %266 : vector<8x32xf32>
    %268 = arith.mulf %263, %267 : vector<8x32xf32>
    %269 = arith.index_cast %232 : i32 to index
    %c0_95 = arith.constant 0 : index
    %270 = vector.load %arg11[%269, %c0_95] : memref<64x32xf32, #tpu.memory_space<vmem>>, vector<8x32xf32>
    tpu.vector_store %arg11[%269, %c0_95], %268 {strides = array<i32>} : memref<64x32xf32, #tpu.memory_space<vmem>>, vector<8x32xf32>,
    %c7_i32 = arith.constant 7 : i32
    %c8_i32_96 = arith.constant 8 : i32
    %271 = arith.muli %c7_i32, %c8_i32_96 : i32
    %272 = tpu.assume_multiple %271, 8 : i32
    %273 = arith.index_cast %272 : i32 to index
    %c0_97 = arith.constant 0 : index
    %274 = vector.load %arg10[%273, %c0_97] : memref<64x128xf32, #tpu.memory_space<vmem>>, vector<8x128xf32>
    %275 = arith.truncf %268 : vector<8x32xf32> to vector<8x32xbf16>
    %cst_98 = arith.constant dense<0.000000e+00> : vector<8x128xf32>
    %276 = tpu.matmul %275, %2, %cst_98 {dimension_numbers = #tpu.dot_dimension_numbers<[1], [0], [0], [1], [0, 0, 1, 1], [], []>} : vector<8x32xbf16>, vector<32x128xbf16>, vector<8x128xf32> -> vector<8x128xf32>
    %277 = arith.addf %274, %276 : vector<8x128xf32>
    %278 = vector.extract_strided_slice %277 {offsets = [0, 0], sizes = [8, 32], strides = [1, 1]} : vector<8x128xf32> to vector<8x32xf32>
    %cst_99 = arith.constant 5.000000e-01 : f32
    %279 = vector.broadcast %cst_99 : f32 to vector<8x32xf32>
    %280 = arith.mulf %279, %278 : vector<8x32xf32>
    %281 = math.tanh %280 : vector<8x32xf32>
    %cst_100 = arith.constant 1.000000e+00 : f32
    %282 = vector.broadcast %cst_100 : f32 to vector<8x32xf32>
    %283 = arith.addf %281, %282 : vector<8x32xf32>
    %cst_101 = arith.constant 5.000000e-01 : f32
    %284 = vector.broadcast %cst_101 : f32 to vector<8x32xf32>
    %285 = arith.mulf %284, %283 : vector<8x32xf32>
    %286 = vector.extract_strided_slice %277 {offsets = [0, 32], sizes = [8, 32], strides = [1, 1]} : vector<8x128xf32> to vector<8x32xf32>
    %cst_102 = arith.constant 5.000000e-01 : f32
    %287 = vector.broadcast %cst_102 : f32 to vector<8x32xf32>
    %288 = arith.mulf %287, %286 : vector<8x32xf32>
    %289 = math.tanh %288 : vector<8x32xf32>
    %cst_103 = arith.constant 1.000000e+00 : f32
    %290 = vector.broadcast %cst_103 : f32 to vector<8x32xf32>
    %291 = arith.addf %289, %290 : vector<8x32xf32>
    %cst_104 = arith.constant 5.000000e-01 : f32
    %292 = vector.broadcast %cst_104 : f32 to vector<8x32xf32>
    %293 = arith.mulf %292, %291 : vector<8x32xf32>
    %294 = vector.extract_strided_slice %277 {offsets = [0, 64], sizes = [8, 32], strides = [1, 1]} : vector<8x128xf32> to vector<8x32xf32>
    %295 = math.tanh %294 : vector<8x32xf32>
    %296 = vector.extract_strided_slice %277 {offsets = [0, 96], sizes = [8, 32], strides = [1, 1]} : vector<8x128xf32> to vector<8x32xf32>
    %cst_105 = arith.constant 5.000000e-01 : f32
    %297 = vector.broadcast %cst_105 : f32 to vector<8x32xf32>
    %298 = arith.mulf %297, %296 : vector<8x32xf32>
    %299 = math.tanh %298 : vector<8x32xf32>
    %cst_106 = arith.constant 1.000000e+00 : f32
    %300 = vector.broadcast %cst_106 : f32 to vector<8x32xf32>
    %301 = arith.addf %299, %300 : vector<8x32xf32>
    %cst_107 = arith.constant 5.000000e-01 : f32
    %302 = vector.broadcast %cst_107 : f32 to vector<8x32xf32>
    %303 = arith.mulf %302, %301 : vector<8x32xf32>
    %304 = arith.mulf %293, %266 : vector<8x32xf32>
    %305 = arith.mulf %285, %295 : vector<8x32xf32>
    %306 = arith.addf %304, %305 : vector<8x32xf32>
    %307 = math.tanh %306 : vector<8x32xf32>
    %308 = arith.mulf %303, %307 : vector<8x32xf32>
    %309 = arith.index_cast %272 : i32 to index
    %c0_108 = arith.constant 0 : index
    %310 = vector.load %arg11[%309, %c0_108] : memref<64x32xf32, #tpu.memory_space<vmem>>, vector<8x32xf32>
    tpu.vector_store %arg11[%309, %c0_108], %308 {strides = array<i32>} : memref<64x32xf32, #tpu.memory_space<vmem>>, vector<8x32xf32>,
    %c7_i32_109 = arith.constant 7 : i32
    %c0_110 = arith.constant 0 : index
    %c0_111 = arith.constant 0 : index
    %311 = vector.load %arg11[%c0_110, %c0_111] : memref<64x32xf32, #tpu.memory_space<vmem>>, vector<64x32xf32>
    %c0_112 = arith.constant 0 : index
    %c0_113 = arith.constant 0 : index
    %312 = vector.load %arg4[%c0_112, %c0_113] : memref<32x128xbf16, #tpu.memory_space<vmem>>, vector<32x128xbf16>
    %c0_114 = arith.constant 0 : index
    %c0_115 = arith.constant 0 : index
    %313 = vector.load %arg5[%c0_114, %c0_115] : memref<32x128xbf16, #tpu.memory_space<vmem>>, vector<32x128xbf16>
    %c0_116 = arith.constant 0 : index
    %c0_117 = arith.constant 0 : index
    %314 = vector.load %arg6[%c0_116, %c0_117] : memref<1x128xf32, #tpu.memory_space<vmem>>, vector<1x128xf32>
    %315 = arith.truncf %311 : vector<64x32xf32> to vector<64x32xbf16>
    %cst_118 = arith.constant dense<0.000000e+00> : vector<64x128xf32>
    %316 = tpu.matmul %315, %312, %cst_118 {dimension_numbers = #tpu.dot_dimension_numbers<[1], [0], [0], [1], [0, 0, 1, 1], [], []>} : vector<64x32xbf16>, vector<32x128xbf16>, vector<64x128xf32> -> vector<64x128xf32>
    %317 = vector.broadcast %314 : vector<1x128xf32> to vector<64x128xf32>
    %318 = arith.addf %316, %317 : vector<64x128xf32>
    %c0_119 = arith.constant 0 : index
    %c0_120 = arith.constant 0 : index
    %319 = vector.load %arg10[%c0_119, %c0_120] : memref<64x128xf32, #tpu.memory_space<vmem>>, vector<64x128xf32>
    tpu.vector_store %arg10[%c0_119, %c0_120], %318 {strides = array<i32>} : memref<64x128xf32, #tpu.memory_space<vmem>>, vector<64x128xf32>,
    %c0_121 = arith.constant 0 : index
    %c0_122 = arith.constant 0 : index
    %320 = vector.load %arg10[%c0_121, %c0_122] : memref<64x128xf32, #tpu.memory_space<vmem>>, vector<8x128xf32>
    %321 = vector.extract_strided_slice %320 {offsets = [0, 0], sizes = [8, 32], strides = [1, 1]} : vector<8x128xf32> to vector<8x32xf32>
    %cst_123 = arith.constant 5.000000e-01 : f32
    %322 = vector.broadcast %cst_123 : f32 to vector<8x32xf32>
    %323 = arith.mulf %322, %321 : vector<8x32xf32>
    %324 = math.tanh %323 : vector<8x32xf32>
    %cst_124 = arith.constant 1.000000e+00 : f32
    %325 = vector.broadcast %cst_124 : f32 to vector<8x32xf32>
    %326 = arith.addf %324, %325 : vector<8x32xf32>
    %cst_125 = arith.constant 5.000000e-01 : f32
    %327 = vector.broadcast %cst_125 : f32 to vector<8x32xf32>
    %328 = arith.mulf %327, %326 : vector<8x32xf32>
    %329 = vector.extract_strided_slice %320 {offsets = [0, 64], sizes = [8, 32], strides = [1, 1]} : vector<8x128xf32> to vector<8x32xf32>
    %330 = math.tanh %329 : vector<8x32xf32>
    %331 = vector.extract_strided_slice %320 {offsets = [0, 96], sizes = [8, 32], strides = [1, 1]} : vector<8x128xf32> to vector<8x32xf32>
    %cst_126 = arith.constant 5.000000e-01 : f32
    %332 = vector.broadcast %cst_126 : f32 to vector<8x32xf32>
    %333 = arith.mulf %332, %331 : vector<8x32xf32>
    %334 = math.tanh %333 : vector<8x32xf32>
    %cst_127 = arith.constant 1.000000e+00 : f32
    %335 = vector.broadcast %cst_127 : f32 to vector<8x32xf32>
    %336 = arith.addf %334, %335 : vector<8x32xf32>
    %cst_128 = arith.constant 5.000000e-01 : f32
    %337 = vector.broadcast %cst_128 : f32 to vector<8x32xf32>
    %338 = arith.mulf %337, %336 : vector<8x32xf32>
    %339 = arith.mulf %328, %330 : vector<8x32xf32>
    %340 = math.tanh %339 : vector<8x32xf32>
    %341 = arith.mulf %338, %340 : vector<8x32xf32>
    %c1_i32_129 = arith.constant 1 : i32
    %c8_i32_130 = arith.constant 8 : i32
    %342 = arith.muli %c1_i32_129, %c8_i32_130 : i32
    %343 = tpu.assume_multiple %342, 8 : i32
    %344 = arith.index_cast %343 : i32 to index
    %c0_131 = arith.constant 0 : index
    %345 = vector.load %arg10[%344, %c0_131] : memref<64x128xf32, #tpu.memory_space<vmem>>, vector<8x128xf32>
    %346 = arith.truncf %341 : vector<8x32xf32> to vector<8x32xbf16>
    %cst_132 = arith.constant dense<0.000000e+00> : vector<8x128xf32>
    %347 = tpu.matmul %346, %313, %cst_132 {dimension_numbers = #tpu.dot_dimension_numbers<[1], [0], [0], [1], [0, 0, 1, 1], [], []>} : vector<8x32xbf16>, vector<32x128xbf16>, vector<8x128xf32> -> vector<8x128xf32>
    %348 = arith.addf %345, %347 : vector<8x128xf32>
    %349 = vector.extract_strided_slice %348 {offsets = [0, 0], sizes = [8, 32], strides = [1, 1]} : vector<8x128xf32> to vector<8x32xf32>
    %cst_133 = arith.constant 5.000000e-01 : f32
    %350 = vector.broadcast %cst_133 : f32 to vector<8x32xf32>
    %351 = arith.mulf %350, %349 : vector<8x32xf32>
    %352 = math.tanh %351 : vector<8x32xf32>
    %cst_134 = arith.constant 1.000000e+00 : f32
    %353 = vector.broadcast %cst_134 : f32 to vector<8x32xf32>
    %354 = arith.addf %352, %353 : vector<8x32xf32>
    %cst_135 = arith.constant 5.000000e-01 : f32
    %355 = vector.broadcast %cst_135 : f32 to vector<8x32xf32>
    %356 = arith.mulf %355, %354 : vector<8x32xf32>
    %357 = vector.extract_strided_slice %348 {offsets = [0, 32], sizes = [8, 32], strides = [1, 1]} : vector<8x128xf32> to vector<8x32xf32>
    %cst_136 = arith.constant 5.000000e-01 : f32
    %358 = vector.broadcast %cst_136 : f32 to vector<8x32xf32>
    %359 = arith.mulf %358, %357 : vector<8x32xf32>
    %360 = math.tanh %359 : vector<8x32xf32>
    %cst_137 = arith.constant 1.000000e+00 : f32
    %361 = vector.broadcast %cst_137 : f32 to vector<8x32xf32>
    %362 = arith.addf %360, %361 : vector<8x32xf32>
    %cst_138 = arith.constant 5.000000e-01 : f32
    %363 = vector.broadcast %cst_138 : f32 to vector<8x32xf32>
    %364 = arith.mulf %363, %362 : vector<8x32xf32>
    %365 = vector.extract_strided_slice %348 {offsets = [0, 64], sizes = [8, 32], strides = [1, 1]} : vector<8x128xf32> to vector<8x32xf32>
    %366 = math.tanh %365 : vector<8x32xf32>
    %367 = vector.extract_strided_slice %348 {offsets = [0, 96], sizes = [8, 32], strides = [1, 1]} : vector<8x128xf32> to vector<8x32xf32>
    %cst_139 = arith.constant 5.000000e-01 : f32
    %368 = vector.broadcast %cst_139 : f32 to vector<8x32xf32>
    %369 = arith.mulf %368, %367 : vector<8x32xf32>
    %370 = math.tanh %369 : vector<8x32xf32>
    %cst_140 = arith.constant 1.000000e+00 : f32
    %371 = vector.broadcast %cst_140 : f32 to vector<8x32xf32>
    %372 = arith.addf %370, %371 : vector<8x32xf32>
    %cst_141 = arith.constant 5.000000e-01 : f32
    %373 = vector.broadcast %cst_141 : f32 to vector<8x32xf32>
    %374 = arith.mulf %373, %372 : vector<8x32xf32>
    %375 = arith.mulf %364, %339 : vector<8x32xf32>
    %376 = arith.mulf %356, %366 : vector<8x32xf32>
    %377 = arith.addf %375, %376 : vector<8x32xf32>
    %378 = math.tanh %377 : vector<8x32xf32>
    %379 = arith.mulf %374, %378 : vector<8x32xf32>
    %c2_i32_142 = arith.constant 2 : i32
    %c8_i32_143 = arith.constant 8 : i32
    %380 = arith.muli %c2_i32_142, %c8_i32_143 : i32
    %381 = tpu.assume_multiple %380, 8 : i32
    %382 = arith.index_cast %381 : i32 to index
    %c0_144 = arith.constant 0 : index
    %383 = vector.load %arg10[%382, %c0_144] : memref<64x128xf32, #tpu.memory_space<vmem>>, vector<8x128xf32>
    %384 = arith.truncf %379 : vector<8x32xf32> to vector<8x32xbf16>
    %cst_145 = arith.constant dense<0.000000e+00> : vector<8x128xf32>
    %385 = tpu.matmul %384, %313, %cst_145 {dimension_numbers = #tpu.dot_dimension_numbers<[1], [0], [0], [1], [0, 0, 1, 1], [], []>} : vector<8x32xbf16>, vector<32x128xbf16>, vector<8x128xf32> -> vector<8x128xf32>
    %386 = arith.addf %383, %385 : vector<8x128xf32>
    %387 = vector.extract_strided_slice %386 {offsets = [0, 0], sizes = [8, 32], strides = [1, 1]} : vector<8x128xf32> to vector<8x32xf32>
    %cst_146 = arith.constant 5.000000e-01 : f32
    %388 = vector.broadcast %cst_146 : f32 to vector<8x32xf32>
    %389 = arith.mulf %388, %387 : vector<8x32xf32>
    %390 = math.tanh %389 : vector<8x32xf32>
    %cst_147 = arith.constant 1.000000e+00 : f32
    %391 = vector.broadcast %cst_147 : f32 to vector<8x32xf32>
    %392 = arith.addf %390, %391 : vector<8x32xf32>
    %cst_148 = arith.constant 5.000000e-01 : f32
    %393 = vector.broadcast %cst_148 : f32 to vector<8x32xf32>
    %394 = arith.mulf %393, %392 : vector<8x32xf32>
    %395 = vector.extract_strided_slice %386 {offsets = [0, 32], sizes = [8, 32], strides = [1, 1]} : vector<8x128xf32> to vector<8x32xf32>
    %cst_149 = arith.constant 5.000000e-01 : f32
    %396 = vector.broadcast %cst_149 : f32 to vector<8x32xf32>
    %397 = arith.mulf %396, %395 : vector<8x32xf32>
    %398 = math.tanh %397 : vector<8x32xf32>
    %cst_150 = arith.constant 1.000000e+00 : f32
    %399 = vector.broadcast %cst_150 : f32 to vector<8x32xf32>
    %400 = arith.addf %398, %399 : vector<8x32xf32>
    %cst_151 = arith.constant 5.000000e-01 : f32
    %401 = vector.broadcast %cst_151 : f32 to vector<8x32xf32>
    %402 = arith.mulf %401, %400 : vector<8x32xf32>
    %403 = vector.extract_strided_slice %386 {offsets = [0, 64], sizes = [8, 32], strides = [1, 1]} : vector<8x128xf32> to vector<8x32xf32>
    %404 = math.tanh %403 : vector<8x32xf32>
    %405 = vector.extract_strided_slice %386 {offsets = [0, 96], sizes = [8, 32], strides = [1, 1]} : vector<8x128xf32> to vector<8x32xf32>
    %cst_152 = arith.constant 5.000000e-01 : f32
    %406 = vector.broadcast %cst_152 : f32 to vector<8x32xf32>
    %407 = arith.mulf %406, %405 : vector<8x32xf32>
    %408 = math.tanh %407 : vector<8x32xf32>
    %cst_153 = arith.constant 1.000000e+00 : f32
    %409 = vector.broadcast %cst_153 : f32 to vector<8x32xf32>
    %410 = arith.addf %408, %409 : vector<8x32xf32>
    %cst_154 = arith.constant 5.000000e-01 : f32
    %411 = vector.broadcast %cst_154 : f32 to vector<8x32xf32>
    %412 = arith.mulf %411, %410 : vector<8x32xf32>
    %413 = arith.mulf %402, %377 : vector<8x32xf32>
    %414 = arith.mulf %394, %404 : vector<8x32xf32>
    %415 = arith.addf %413, %414 : vector<8x32xf32>
    %416 = math.tanh %415 : vector<8x32xf32>
    %417 = arith.mulf %412, %416 : vector<8x32xf32>
    %c3_i32_155 = arith.constant 3 : i32
    %c8_i32_156 = arith.constant 8 : i32
    %418 = arith.muli %c3_i32_155, %c8_i32_156 : i32
    %419 = tpu.assume_multiple %418, 8 : i32
    %420 = arith.index_cast %419 : i32 to index
    %c0_157 = arith.constant 0 : index
    %421 = vector.load %arg10[%420, %c0_157] : memref<64x128xf32, #tpu.memory_space<vmem>>, vector<8x128xf32>
    %422 = arith.truncf %417 : vector<8x32xf32> to vector<8x32xbf16>
    %cst_158 = arith.constant dense<0.000000e+00> : vector<8x128xf32>
    %423 = tpu.matmul %422, %313, %cst_158 {dimension_numbers = #tpu.dot_dimension_numbers<[1], [0], [0], [1], [0, 0, 1, 1], [], []>} : vector<8x32xbf16>, vector<32x128xbf16>, vector<8x128xf32> -> vector<8x128xf32>
    %424 = arith.addf %421, %423 : vector<8x128xf32>
    %425 = vector.extract_strided_slice %424 {offsets = [0, 0], sizes = [8, 32], strides = [1, 1]} : vector<8x128xf32> to vector<8x32xf32>
    %cst_159 = arith.constant 5.000000e-01 : f32
    %426 = vector.broadcast %cst_159 : f32 to vector<8x32xf32>
    %427 = arith.mulf %426, %425 : vector<8x32xf32>
    %428 = math.tanh %427 : vector<8x32xf32>
    %cst_160 = arith.constant 1.000000e+00 : f32
    %429 = vector.broadcast %cst_160 : f32 to vector<8x32xf32>
    %430 = arith.addf %428, %429 : vector<8x32xf32>
    %cst_161 = arith.constant 5.000000e-01 : f32
    %431 = vector.broadcast %cst_161 : f32 to vector<8x32xf32>
    %432 = arith.mulf %431, %430 : vector<8x32xf32>
    %433 = vector.extract_strided_slice %424 {offsets = [0, 32], sizes = [8, 32], strides = [1, 1]} : vector<8x128xf32> to vector<8x32xf32>
    %cst_162 = arith.constant 5.000000e-01 : f32
    %434 = vector.broadcast %cst_162 : f32 to vector<8x32xf32>
    %435 = arith.mulf %434, %433 : vector<8x32xf32>
    %436 = math.tanh %435 : vector<8x32xf32>
    %cst_163 = arith.constant 1.000000e+00 : f32
    %437 = vector.broadcast %cst_163 : f32 to vector<8x32xf32>
    %438 = arith.addf %436, %437 : vector<8x32xf32>
    %cst_164 = arith.constant 5.000000e-01 : f32
    %439 = vector.broadcast %cst_164 : f32 to vector<8x32xf32>
    %440 = arith.mulf %439, %438 : vector<8x32xf32>
    %441 = vector.extract_strided_slice %424 {offsets = [0, 64], sizes = [8, 32], strides = [1, 1]} : vector<8x128xf32> to vector<8x32xf32>
    %442 = math.tanh %441 : vector<8x32xf32>
    %443 = vector.extract_strided_slice %424 {offsets = [0, 96], sizes = [8, 32], strides = [1, 1]} : vector<8x128xf32> to vector<8x32xf32>
    %cst_165 = arith.constant 5.000000e-01 : f32
    %444 = vector.broadcast %cst_165 : f32 to vector<8x32xf32>
    %445 = arith.mulf %444, %443 : vector<8x32xf32>
    %446 = math.tanh %445 : vector<8x32xf32>
    %cst_166 = arith.constant 1.000000e+00 : f32
    %447 = vector.broadcast %cst_166 : f32 to vector<8x32xf32>
    %448 = arith.addf %446, %447 : vector<8x32xf32>
    %cst_167 = arith.constant 5.000000e-01 : f32
    %449 = vector.broadcast %cst_167 : f32 to vector<8x32xf32>
    %450 = arith.mulf %449, %448 : vector<8x32xf32>
    %451 = arith.mulf %440, %415 : vector<8x32xf32>
    %452 = arith.mulf %432, %442 : vector<8x32xf32>
    %453 = arith.addf %451, %452 : vector<8x32xf32>
    %454 = math.tanh %453 : vector<8x32xf32>
    %455 = arith.mulf %450, %454 : vector<8x32xf32>
    %c4_i32_168 = arith.constant 4 : i32
    %c8_i32_169 = arith.constant 8 : i32
    %456 = arith.muli %c4_i32_168, %c8_i32_169 : i32
    %457 = tpu.assume_multiple %456, 8 : i32
    %458 = arith.index_cast %457 : i32 to index
    %c0_170 = arith.constant 0 : index
    %459 = vector.load %arg10[%458, %c0_170] : memref<64x128xf32, #tpu.memory_space<vmem>>, vector<8x128xf32>
    %460 = arith.truncf %455 : vector<8x32xf32> to vector<8x32xbf16>
    %cst_171 = arith.constant dense<0.000000e+00> : vector<8x128xf32>
    %461 = tpu.matmul %460, %313, %cst_171 {dimension_numbers = #tpu.dot_dimension_numbers<[1], [0], [0], [1], [0, 0, 1, 1], [], []>} : vector<8x32xbf16>, vector<32x128xbf16>, vector<8x128xf32> -> vector<8x128xf32>
    %462 = arith.addf %459, %461 : vector<8x128xf32>
    %463 = vector.extract_strided_slice %462 {offsets = [0, 0], sizes = [8, 32], strides = [1, 1]} : vector<8x128xf32> to vector<8x32xf32>
    %cst_172 = arith.constant 5.000000e-01 : f32
    %464 = vector.broadcast %cst_172 : f32 to vector<8x32xf32>
    %465 = arith.mulf %464, %463 : vector<8x32xf32>
    %466 = math.tanh %465 : vector<8x32xf32>
    %cst_173 = arith.constant 1.000000e+00 : f32
    %467 = vector.broadcast %cst_173 : f32 to vector<8x32xf32>
    %468 = arith.addf %466, %467 : vector<8x32xf32>
    %cst_174 = arith.constant 5.000000e-01 : f32
    %469 = vector.broadcast %cst_174 : f32 to vector<8x32xf32>
    %470 = arith.mulf %469, %468 : vector<8x32xf32>
    %471 = vector.extract_strided_slice %462 {offsets = [0, 32], sizes = [8, 32], strides = [1, 1]} : vector<8x128xf32> to vector<8x32xf32>
    %cst_175 = arith.constant 5.000000e-01 : f32
    %472 = vector.broadcast %cst_175 : f32 to vector<8x32xf32>
    %473 = arith.mulf %472, %471 : vector<8x32xf32>
    %474 = math.tanh %473 : vector<8x32xf32>
    %cst_176 = arith.constant 1.000000e+00 : f32
    %475 = vector.broadcast %cst_176 : f32 to vector<8x32xf32>
    %476 = arith.addf %474, %475 : vector<8x32xf32>
    %cst_177 = arith.constant 5.000000e-01 : f32
    %477 = vector.broadcast %cst_177 : f32 to vector<8x32xf32>
    %478 = arith.mulf %477, %476 : vector<8x32xf32>
    %479 = vector.extract_strided_slice %462 {offsets = [0, 64], sizes = [8, 32], strides = [1, 1]} : vector<8x128xf32> to vector<8x32xf32>
    %480 = math.tanh %479 : vector<8x32xf32>
    %481 = vector.extract_strided_slice %462 {offsets = [0, 96], sizes = [8, 32], strides = [1, 1]} : vector<8x128xf32> to vector<8x32xf32>
    %cst_178 = arith.constant 5.000000e-01 : f32
    %482 = vector.broadcast %cst_178 : f32 to vector<8x32xf32>
    %483 = arith.mulf %482, %481 : vector<8x32xf32>
    %484 = math.tanh %483 : vector<8x32xf32>
    %cst_179 = arith.constant 1.000000e+00 : f32
    %485 = vector.broadcast %cst_179 : f32 to vector<8x32xf32>
    %486 = arith.addf %484, %485 : vector<8x32xf32>
    %cst_180 = arith.constant 5.000000e-01 : f32
    %487 = vector.broadcast %cst_180 : f32 to vector<8x32xf32>
    %488 = arith.mulf %487, %486 : vector<8x32xf32>
    %489 = arith.mulf %478, %453 : vector<8x32xf32>
    %490 = arith.mulf %470, %480 : vector<8x32xf32>
    %491 = arith.addf %489, %490 : vector<8x32xf32>
    %492 = math.tanh %491 : vector<8x32xf32>
    %493 = arith.mulf %488, %492 : vector<8x32xf32>
    %c5_i32_181 = arith.constant 5 : i32
    %c8_i32_182 = arith.constant 8 : i32
    %494 = arith.muli %c5_i32_181, %c8_i32_182 : i32
    %495 = tpu.assume_multiple %494, 8 : i32
    %496 = arith.index_cast %495 : i32 to index
    %c0_183 = arith.constant 0 : index
    %497 = vector.load %arg10[%496, %c0_183] : memref<64x128xf32, #tpu.memory_space<vmem>>, vector<8x128xf32>
    %498 = arith.truncf %493 : vector<8x32xf32> to vector<8x32xbf16>
    %cst_184 = arith.constant dense<0.000000e+00> : vector<8x128xf32>
    %499 = tpu.matmul %498, %313, %cst_184 {dimension_numbers = #tpu.dot_dimension_numbers<[1], [0], [0], [1], [0, 0, 1, 1], [], []>} : vector<8x32xbf16>, vector<32x128xbf16>, vector<8x128xf32> -> vector<8x128xf32>
    %500 = arith.addf %497, %499 : vector<8x128xf32>
    %501 = vector.extract_strided_slice %500 {offsets = [0, 0], sizes = [8, 32], strides = [1, 1]} : vector<8x128xf32> to vector<8x32xf32>
    %cst_185 = arith.constant 5.000000e-01 : f32
    %502 = vector.broadcast %cst_185 : f32 to vector<8x32xf32>
    %503 = arith.mulf %502, %501 : vector<8x32xf32>
    %504 = math.tanh %503 : vector<8x32xf32>
    %cst_186 = arith.constant 1.000000e+00 : f32
    %505 = vector.broadcast %cst_186 : f32 to vector<8x32xf32>
    %506 = arith.addf %504, %505 : vector<8x32xf32>
    %cst_187 = arith.constant 5.000000e-01 : f32
    %507 = vector.broadcast %cst_187 : f32 to vector<8x32xf32>
    %508 = arith.mulf %507, %506 : vector<8x32xf32>
    %509 = vector.extract_strided_slice %500 {offsets = [0, 32], sizes = [8, 32], strides = [1, 1]} : vector<8x128xf32> to vector<8x32xf32>
    %cst_188 = arith.constant 5.000000e-01 : f32
    %510 = vector.broadcast %cst_188 : f32 to vector<8x32xf32>
    %511 = arith.mulf %510, %509 : vector<8x32xf32>
    %512 = math.tanh %511 : vector<8x32xf32>
    %cst_189 = arith.constant 1.000000e+00 : f32
    %513 = vector.broadcast %cst_189 : f32 to vector<8x32xf32>
    %514 = arith.addf %512, %513 : vector<8x32xf32>
    %cst_190 = arith.constant 5.000000e-01 : f32
    %515 = vector.broadcast %cst_190 : f32 to vector<8x32xf32>
    %516 = arith.mulf %515, %514 : vector<8x32xf32>
    %517 = vector.extract_strided_slice %500 {offsets = [0, 64], sizes = [8, 32], strides = [1, 1]} : vector<8x128xf32> to vector<8x32xf32>
    %518 = math.tanh %517 : vector<8x32xf32>
    %519 = vector.extract_strided_slice %500 {offsets = [0, 96], sizes = [8, 32], strides = [1, 1]} : vector<8x128xf32> to vector<8x32xf32>
    %cst_191 = arith.constant 5.000000e-01 : f32
    %520 = vector.broadcast %cst_191 : f32 to vector<8x32xf32>
    %521 = arith.mulf %520, %519 : vector<8x32xf32>
    %522 = math.tanh %521 : vector<8x32xf32>
    %cst_192 = arith.constant 1.000000e+00 : f32
    %523 = vector.broadcast %cst_192 : f32 to vector<8x32xf32>
    %524 = arith.addf %522, %523 : vector<8x32xf32>
    %cst_193 = arith.constant 5.000000e-01 : f32
    %525 = vector.broadcast %cst_193 : f32 to vector<8x32xf32>
    %526 = arith.mulf %525, %524 : vector<8x32xf32>
    %527 = arith.mulf %516, %491 : vector<8x32xf32>
    %528 = arith.mulf %508, %518 : vector<8x32xf32>
    %529 = arith.addf %527, %528 : vector<8x32xf32>
    %530 = math.tanh %529 : vector<8x32xf32>
    %531 = arith.mulf %526, %530 : vector<8x32xf32>
    %c6_i32_194 = arith.constant 6 : i32
    %c8_i32_195 = arith.constant 8 : i32
    %532 = arith.muli %c6_i32_194, %c8_i32_195 : i32
    %533 = tpu.assume_multiple %532, 8 : i32
    %534 = arith.index_cast %533 : i32 to index
    %c0_196 = arith.constant 0 : index
    %535 = vector.load %arg10[%534, %c0_196] : memref<64x128xf32, #tpu.memory_space<vmem>>, vector<8x128xf32>
    %536 = arith.truncf %531 : vector<8x32xf32> to vector<8x32xbf16>
    %cst_197 = arith.constant dense<0.000000e+00> : vector<8x128xf32>
    %537 = tpu.matmul %536, %313, %cst_197 {dimension_numbers = #tpu.dot_dimension_numbers<[1], [0], [0], [1], [0, 0, 1, 1], [], []>} : vector<8x32xbf16>, vector<32x128xbf16>, vector<8x128xf32> -> vector<8x128xf32>
    %538 = arith.addf %535, %537 : vector<8x128xf32>
    %539 = vector.extract_strided_slice %538 {offsets = [0, 0], sizes = [8, 32], strides = [1, 1]} : vector<8x128xf32> to vector<8x32xf32>
    %cst_198 = arith.constant 5.000000e-01 : f32
    %540 = vector.broadcast %cst_198 : f32 to vector<8x32xf32>
    %541 = arith.mulf %540, %539 : vector<8x32xf32>
    %542 = math.tanh %541 : vector<8x32xf32>
    %cst_199 = arith.constant 1.000000e+00 : f32
    %543 = vector.broadcast %cst_199 : f32 to vector<8x32xf32>
    %544 = arith.addf %542, %543 : vector<8x32xf32>
    %cst_200 = arith.constant 5.000000e-01 : f32
    %545 = vector.broadcast %cst_200 : f32 to vector<8x32xf32>
    %546 = arith.mulf %545, %544 : vector<8x32xf32>
    %547 = vector.extract_strided_slice %538 {offsets = [0, 32], sizes = [8, 32], strides = [1, 1]} : vector<8x128xf32> to vector<8x32xf32>
    %cst_201 = arith.constant 5.000000e-01 : f32
    %548 = vector.broadcast %cst_201 : f32 to vector<8x32xf32>
    %549 = arith.mulf %548, %547 : vector<8x32xf32>
    %550 = math.tanh %549 : vector<8x32xf32>
    %cst_202 = arith.constant 1.000000e+00 : f32
    %551 = vector.broadcast %cst_202 : f32 to vector<8x32xf32>
    %552 = arith.addf %550, %551 : vector<8x32xf32>
    %cst_203 = arith.constant 5.000000e-01 : f32
    %553 = vector.broadcast %cst_203 : f32 to vector<8x32xf32>
    %554 = arith.mulf %553, %552 : vector<8x32xf32>
    %555 = vector.extract_strided_slice %538 {offsets = [0, 64], sizes = [8, 32], strides = [1, 1]} : vector<8x128xf32> to vector<8x32xf32>
    %556 = math.tanh %555 : vector<8x32xf32>
    %557 = vector.extract_strided_slice %538 {offsets = [0, 96], sizes = [8, 32], strides = [1, 1]} : vector<8x128xf32> to vector<8x32xf32>
    %cst_204 = arith.constant 5.000000e-01 : f32
    %558 = vector.broadcast %cst_204 : f32 to vector<8x32xf32>
    %559 = arith.mulf %558, %557 : vector<8x32xf32>
    %560 = math.tanh %559 : vector<8x32xf32>
    %cst_205 = arith.constant 1.000000e+00 : f32
    %561 = vector.broadcast %cst_205 : f32 to vector<8x32xf32>
    %562 = arith.addf %560, %561 : vector<8x32xf32>
    %cst_206 = arith.constant 5.000000e-01 : f32
    %563 = vector.broadcast %cst_206 : f32 to vector<8x32xf32>
    %564 = arith.mulf %563, %562 : vector<8x32xf32>
    %565 = arith.mulf %554, %529 : vector<8x32xf32>
    %566 = arith.mulf %546, %556 : vector<8x32xf32>
    %567 = arith.addf %565, %566 : vector<8x32xf32>
    %568 = math.tanh %567 : vector<8x32xf32>
    %569 = arith.mulf %564, %568 : vector<8x32xf32>
    %c7_i32_207 = arith.constant 7 : i32
    %c8_i32_208 = arith.constant 8 : i32
    %570 = arith.muli %c7_i32_207, %c8_i32_208 : i32
    %571 = tpu.assume_multiple %570, 8 : i32
    %572 = arith.index_cast %571 : i32 to index
    %c0_209 = arith.constant 0 : index
    %573 = vector.load %arg10[%572, %c0_209] : memref<64x128xf32, #tpu.memory_space<vmem>>, vector<8x128xf32>
    %574 = arith.truncf %569 : vector<8x32xf32> to vector<8x32xbf16>
    %cst_210 = arith.constant dense<0.000000e+00> : vector<8x128xf32>
    %575 = tpu.matmul %574, %313, %cst_210 {dimension_numbers = #tpu.dot_dimension_numbers<[1], [0], [0], [1], [0, 0, 1, 1], [], []>} : vector<8x32xbf16>, vector<32x128xbf16>, vector<8x128xf32> -> vector<8x128xf32>
    %576 = arith.addf %573, %575 : vector<8x128xf32>
    %577 = vector.extract_strided_slice %576 {offsets = [0, 0], sizes = [8, 32], strides = [1, 1]} : vector<8x128xf32> to vector<8x32xf32>
    %cst_211 = arith.constant 5.000000e-01 : f32
    %578 = vector.broadcast %cst_211 : f32 to vector<8x32xf32>
    %579 = arith.mulf %578, %577 : vector<8x32xf32>
    %580 = math.tanh %579 : vector<8x32xf32>
    %cst_212 = arith.constant 1.000000e+00 : f32
    %581 = vector.broadcast %cst_212 : f32 to vector<8x32xf32>
    %582 = arith.addf %580, %581 : vector<8x32xf32>
    %cst_213 = arith.constant 5.000000e-01 : f32
    %583 = vector.broadcast %cst_213 : f32 to vector<8x32xf32>
    %584 = arith.mulf %583, %582 : vector<8x32xf32>
    %585 = vector.extract_strided_slice %576 {offsets = [0, 32], sizes = [8, 32], strides = [1, 1]} : vector<8x128xf32> to vector<8x32xf32>
    %cst_214 = arith.constant 5.000000e-01 : f32
    %586 = vector.broadcast %cst_214 : f32 to vector<8x32xf32>
    %587 = arith.mulf %586, %585 : vector<8x32xf32>
    %588 = math.tanh %587 : vector<8x32xf32>
    %cst_215 = arith.constant 1.000000e+00 : f32
    %589 = vector.broadcast %cst_215 : f32 to vector<8x32xf32>
    %590 = arith.addf %588, %589 : vector<8x32xf32>
    %cst_216 = arith.constant 5.000000e-01 : f32
    %591 = vector.broadcast %cst_216 : f32 to vector<8x32xf32>
    %592 = arith.mulf %591, %590 : vector<8x32xf32>
    %593 = vector.extract_strided_slice %576 {offsets = [0, 64], sizes = [8, 32], strides = [1, 1]} : vector<8x128xf32> to vector<8x32xf32>
    %594 = math.tanh %593 : vector<8x32xf32>
    %595 = vector.extract_strided_slice %576 {offsets = [0, 96], sizes = [8, 32], strides = [1, 1]} : vector<8x128xf32> to vector<8x32xf32>
    %cst_217 = arith.constant 5.000000e-01 : f32
    %596 = vector.broadcast %cst_217 : f32 to vector<8x32xf32>
    %597 = arith.mulf %596, %595 : vector<8x32xf32>
    %598 = math.tanh %597 : vector<8x32xf32>
    %cst_218 = arith.constant 1.000000e+00 : f32
    %599 = vector.broadcast %cst_218 : f32 to vector<8x32xf32>
    %600 = arith.addf %598, %599 : vector<8x32xf32>
    %cst_219 = arith.constant 5.000000e-01 : f32
    %601 = vector.broadcast %cst_219 : f32 to vector<8x32xf32>
    %602 = arith.mulf %601, %600 : vector<8x32xf32>
    %603 = arith.mulf %592, %567 : vector<8x32xf32>
    %604 = arith.mulf %584, %594 : vector<8x32xf32>
    %605 = arith.addf %603, %604 : vector<8x32xf32>
    %606 = math.tanh %605 : vector<8x32xf32>
    %607 = arith.mulf %602, %606 : vector<8x32xf32>
    %c7_i32_220 = arith.constant 7 : i32
    %c0_221 = arith.constant 0 : index
    %c0_222 = arith.constant 0 : index
    %608 = vector.load %arg7[%c0_221, %c0_222] : memref<1x32xf32, #tpu.memory_space<vmem>>, vector<1x32xf32>
    %609 = vector.broadcast %608 : vector<1x32xf32> to vector<8x32xf32>
    %610 = arith.mulf %607, %609 : vector<8x32xf32>
    %cst_223 = arith.constant dense<0.000000e+00> : vector<8xf32>
    %611 = vector.multi_reduction <add>, %610, %cst_223 [1] : vector<8x32xf32> to vector<8xf32>
    %612 = vector.shape_cast %611 : vector<8xf32> to vector<8x1xf32>
    %c0_224 = arith.constant 0 : index
    %c0_225 = arith.constant 0 : index
    %613 = vector.load %arg8[%c0_224, %c0_225] : memref<1x1xf32, #tpu.memory_space<vmem>>, vector<1x1xf32>
    %614 = vector.broadcast %613 : vector<1x1xf32> to vector<8x1xf32>
    %615 = arith.addf %612, %614 : vector<8x1xf32>
    %c0_226 = arith.constant 0 : index
    %c0_227 = arith.constant 0 : index
    %616 = vector.load %arg9[%c0_226, %c0_227] : memref<8x1xf32, #tpu.memory_space<vmem>>, vector<8x1xf32>
    tpu.vector_store %arg9[%c0_226, %c0_227], %615 {strides = array<i32>} : memref<8x1xf32, #tpu.memory_space<vmem>>, vector<8x1xf32>,
    return
  }
}

</mosaic_0001>

<bundles_post_ra>
// kernel: lstm_model_forward.1
= control target key start
LH: loop header
LB: loop body
LE: loop exit
PB: predicated region body
PF: predicated region fallthrough
CT: control target
= control target key end

     0   :  { %vm88_vm0 = vcmask 1041408   ;;  %vm75_vm1 = vcmask 31744   ;;  %v1771_v17 = vmov 0.0   ;;  %vm1772_vm2 = vmmov 0   ;;  %s1773_s20 = smov 96   ;;  %s2164_s1 = inlined_call_operand.vmem [shape: bf16[4,128], index: 1, kind: input, shape index: {}]   ;;  %s2165_s0 = inlined_call_operand.vmem [shape: bf16[64,4], index: 0, kind: input, shape index: {}]   ;;  %s2166_s3 = inlined_call_operand.vmem [shape: f32[1,128], index: 3, kind: input, shape index: {}]   ;;  %s2167_s2 = inlined_call_operand.vmem [shape: bf16[32,128], index: 2, kind: input, shape index: {}]   ;;  %s2168_s4 = inlined_call_operand.vmem [shape: bf16[32,128], index: 4, kind: input, shape index: {}]   ;;  %s2169_s6 = inlined_call_operand.vmem [shape: f32[1,128], index: 6, kind: input, shape index: {}]   ;;  %s2170_s5 = inlined_call_operand.vmem [shape: bf16[32,128], index: 5, kind: input, shape index: {}]   ;;  %s2171_s7 = inlined_call_operand.vmem [shape: f32[1,32], index: 7, kind: input, shape index: {}]   ;;  %s2172_s8 = inlined_call_operand.<no memory space> [shape: f32[1,1], index: 8, kind: input, shape index: {}]   ;;  %s2173_s9 = inlined_call_operand.vmem [shape: f32[8,1], index: 9, kind: output, shape index: {}]  }
   0x1   :  { %v43_v0 = vld [vmem:[%s2164_s1] sm:$0x3]  ;;  %v1665_v3 = vld [vmem:[%s2165_s0 + $0x8] sm:$0xff]   ;;  %s1770_s1 = smov 64   ;;  %1534 = vmatprep.subr.bf16.mxu1 %v1771_v17  ;;  %1538 = vmatprep.mubr.msk.bf16.mxu1 %vm1772_vm2, %v1771_v17  ;;  %vm186_vm3 = vcmask 261120   ;;  %v1668_v63 = vld [vmem:[%s2165_s0 + $0x10] sm:$0xff]  }
   0x2   :  { %1658 = vmatprep.subr.msk.bf16.mxu0 %vm88_vm0, %v43_v0  ;;  %v90_v1 = vsel %vm88_vm0, %v43_v0, 0  ;;  %v1664_v2 = vld [vmem:[%s2165_s0] sm:$0xff]   ;;  %v1860_v19 = vld [vmem:[%s2167_s2 + $0x8] sm:$0xff]   ;;  %v1669_v0 = vld [vmem:[%s2165_s0 + $0x18] sm:$0xff]   ;;  %vm1429_vm4 = vcmask 7168  }
   0x3   :  { %1525 = vmatpush3.bf16.msra.mxu0 %v90_v1  ;;  %1526 = vmatprep.mubr.msk.bf16.mxu0 %vm75_vm1, %v1664_v2  ;;  %v1839_v4 = vld [vmem:[%s2166_s3] ss:$0 sm:$0xff] }
   0x4   :  { %v1851_v18 = vld [vmem:[%s2167_s2] sm:$0xff]   ;;  %1550 = vmatprep.subr.bf16.mxu0 %v1771_v17  ;;  %s1774_s2 = smov 32  }
   0x5   :  { %1535 = vmatpush3.bf16.msra.mxu1 %v1851_v18 }
   0x6   :  { %1527 = vmatmul.mubr.msk.bf16.vlgmr.msra.gmra.mrb[0].mxu0 %vm75_vm1, %v1665_v3  ;;  %1536 = vmatprep.subr.bf16.mxu1 %v1771_v17 }
   0x7   :  { %1551 = vmatpush3.bf16.msra.mxu0 %v1851_v18  ;;  %1530 = vmatprep.mubr.msk.bf16.mxu0 %vm75_vm1, %v1668_v63 }
   0x8   :  { %1552 = vmatprep.subr.bf16.mxu0 %v1771_v17 }
   0x9   :  { %1537 = vmatpush3.bf16.msra.mxu1 %v1860_v19 }
   0xa   :  { %1542 = vmatprep.subr.bf16.mxu1 %v1771_v17 }
   0xb   :  { %1553 = vmatpush3.bf16.msra.mxu0 %v1860_v19 }
   0xc   :  { %1566 = vmatprep.subr.bf16.mxu0 %v1771_v17 }
   0xe   :  { %1531 = vmatmul.mubr.msk.bf16.gmra.mrb[4].mxu0 %vm75_vm1, %v1669_v0 }
   0xf   :  { %1554 = vmatprep.mubr.msk.bf16.mxu0 %vm1772_vm2, %v1771_v17 }
  0xd9   :  { %v1841_v5 = vpop.f32.mrb[0].mxu0 }
  0xda   :  { %v126_v6 = vpop.f32.mrb[1].mxu0  ;;  %v135_v47 = vadd.f32 %v1841_v5, %v1839_v4 }
  0xdb   :  { %v127_v7 = vadd.f32 %v1839_v4, %v126_v6  ;;  %v1844_v8 = vpop.f32.mrb[2].mxu0 }
  0xdc   :  { %v129_v9 = vpop.f32.mrb[3].mxu0 }
  0xdd   :  { %1674 = vtanh.f32 %v127_v7  ;;  %v166_v11 = vmul.f32 0.5, %v127_v7  ;;  %v130_v25 = vadd.f32 %v1839_v4, %v129_v9 }
  0xdf   :  { %1676 = vtanh.f32 %v166_v11 }
  0xe1   :  { %v1919_v6 = vpop.f32.mrb[4].mxu0 }
  0xe2   :  { %v142_v7 = vpop.f32.mrb[5].mxu0 }
  0xe3   :  { %v1921_v9 = vpop.f32.mrb[6].mxu0 }
  0xe7   :  { %v1675_v10 = vpop.eup %1674 }
  0xe8   :  { %172 = vrot.lane.b32.xlu0 %v1675_v10, %s1770_s1  ;;  %v1923_v10 = vpop.f32.mrb[7].mxu0 }
  0xe9   :  { %v1677_v12 = vpop.eup %1676 }
  0xea   :  { %v168_v13 = vadd.f32 1.0, %v1677_v12  ;;  %v138_v12 = vadd.f32 %v1844_v8, %v1839_v4 }
  0xec   :  { %v169_v14 = vmul.f32 0.5, %v168_v13 }
 0x15a   :  { %v173_v15 = vpop.permute.xlu0 %172 }
 0x15b   :  { %v175_v16 = vmul.f32 %v173_v15, %v169_v14 }
 0x15d   :  { %1678 = vtanh.f32 %v175_v16 }
 0x167   :  { %v1679_v20 = vpop.eup %1678 }
 0x168   :  { %178 = vrot.lane.b32.xlu0 %v1679_v20, %s1773_s20 }
 0x16c   :  { %256 = vrot.lane.b32.xlu0 %v175_v16, %s1774_s2 }
 0x1da   :  { %v179_v21 = vpop.permute.xlu0 %178 }
 0x1db   :  { %v1871_v22 = vmul.f32 %v179_v21, %v169_v14 }
 0x1dd   :  { %v190_v23 = vpack.c.bf16 %v1871_v22, %v1871_v22 }
 0x1de   :  { %v257_v38 = vpop.permute.xlu0 %256 }
 0x1df   :  { %192 = vrot.lane.b32.xlu1 %v190_v23, %s1774_s2 }
 0x251   :  { %v193_v24 = vpop.permute.xlu1 %192 }
 0x252   :  { %1539 = vmatmul.mubr.msk.bf16.vlgmr.msra.gmra.mrb[0].mxu1 %vm186_vm3, %v193_v24 }
 0x253   :  { %1543 = vmatpush3.bf16.msra.mxu1 %v1851_v18  ;;  %1546 = vmatprep.mubr.msk.bf16.mxu1 %vm1772_vm2, %v1771_v17 }
 0x254   :  { %1544 = vmatprep.subr.bf16.mxu1 %v1771_v17 }
 0x257   :  { %1545 = vmatpush3.bf16.msra.mxu1 %v1860_v19 }
 0x258   :  { %1558 = vmatprep.subr.bf16.mxu1 %v1771_v17 }
 0x325   :  { %v243_v26 = vpop.f32.mrb[0].mxu1 }
 0x326   :  { %v249_v27 = vadd.f32 %v243_v26, %v130_v25  ;;  %v1540_v28 = vpop.f32.mrb[1].mxu1 }
 0x327   :  { %v246_v29 = vpop.f32.mrb[2].mxu1 }
 0x328   :  { %1680 = vtanh.f32 %v249_v27  ;;  %v1541_v30 = vpop.f32.mrb[3].mxu1  ;;  %v250_v32 = vmul.f32 0.5, %v249_v27 }
 0x32a   :  { %1682 = vtanh.f32 %v250_v32 }
 0x332   :  { %v1681_v31 = vpop.eup %1680 }
 0x333   :  { %261 = vrot.lane.b32.xlu1 %v1681_v31, %s1770_s1 }
 0x334   :  { %v1683_v33 = vpop.eup %1682 }
 0x335   :  { %v252_v34 = vadd.f32 1.0, %v1683_v33 }
 0x337   :  { %v253_v35 = vmul.f32 0.5, %v252_v34 }
 0x339   :  { %v259_v39 = vmul.f32 %v257_v38, %v253_v35 }
 0x3a5   :  { %v262_v36 = vpop.permute.xlu1 %261 }
 0x3a6   :  { %v264_v37 = vmul.f32 %v262_v36, %v253_v35  ;;  %v143_v36 = vadd.f32 %v1839_v4, %v142_v7 }
 0x3a8   :  { %266 = vrot.lane.b32.xlu1 %v264_v37, %s1774_s2 }
 0x41a   :  { %v267_v40 = vpop.permute.xlu1 %266 }
 0x41b   :  { %v269_v41 = vadd.f32 %v267_v40, %v259_v39 }
 0x41d   :  { %1684 = vtanh.f32 %v269_v41 }
 0x427   :  { %v1685_v42 = vpop.eup %1684 }
 0x428   :  { %272 = vrot.lane.b32.xlu0 %v1685_v42, %s1770_s1 }
 0x49a   :  { %v273_v43 = vpop.permute.xlu0 %272 }
 0x49b   :  { %v1887_v44 = vmul.f32 %v273_v43, %v253_v35 }
 0x49d   :  { %v284_v45 = vpack.c.bf16 %v1887_v44, %v1887_v44 }
 0x49f   :  { %286 = vrot.lane.b32.xlu1 %v284_v45, %s1774_s2 }
 0x511   :  { %v287_v46 = vpop.permute.xlu1 %286 }
 0x512   :  { %1547 = vmatmul.mubr.msk.bf16.vlgmr.msra.gmra.mrb[4].mxu1 %vm186_vm3, %v287_v46 }
 0x513   :  { %1559 = vmatpush3.bf16.msra.mxu1 %v1851_v18  ;;  %1562 = vmatprep.mubr.msk.bf16.mxu1 %vm1772_vm2, %v1771_v17 }
 0x514   :  { %1560 = vmatprep.subr.bf16.mxu1 %v1771_v17 }
 0x517   :  { %1561 = vmatpush3.bf16.msra.mxu1 %v1860_v19 }
 0x518   :  { %1574 = vmatprep.subr.bf16.mxu1 %v1771_v17 }
 0x5e5   :  { %v325_v48 = vpop.f32.mrb[4].mxu1 }
 0x5e6   :  { %v331_v49 = vadd.f32 %v325_v48, %v135_v47  ;;  %v1548_v50 = vpop.f32.mrb[5].mxu1 }
 0x5e7   :  { %v328_v51 = vpop.f32.mrb[6].mxu1 }
 0x5e8   :  { %1686 = vtanh.f32 %v331_v49  ;;  %v1549_v52 = vpop.f32.mrb[7].mxu1  ;;  %v332_v54 = vmul.f32 0.5, %v331_v49 }
 0x5ea   :  { %1688 = vtanh.f32 %v332_v54 }
 0x5f2   :  { %v1687_v53 = vpop.eup %1686 }
 0x5f3   :  { %339 = vrot.lane.b32.xlu0 %v1687_v53, %s1770_s1 }
 0x5f4   :  { %v1689_v55 = vpop.eup %1688 }
 0x5f5   :  { %v334_v56 = vadd.f32 1.0, %v1689_v55 }
 0x5f7   :  { %v335_v57 = vmul.f32 0.5, %v334_v56 }
 0x5f9   :  { %v337_v60 = vmul.f32 %v335_v57, %v269_v41 }
 0x665   :  { %v340_v58 = vpop.permute.xlu0 %339 }
 0x666   :  { %v342_v59 = vmul.f32 %v340_v58, %v335_v57  ;;  %v146_v58 = vadd.f32 %v1839_v4, %v1923_v10 }
 0x668   :  { %344 = vrot.lane.b32.xlu1 %v342_v59, %s1774_s2 }
 0x6da   :  { %v345_v61 = vpop.permute.xlu1 %344 }
 0x6db   :  { %v347_v62 = vadd.f32 %v345_v61, %v337_v60 }
 0x6dd   :  { %1690 = vtanh.f32 %v347_v62 }
 0x6e7   :  { %v1691_v1 = vpop.eup %1690 }
 0x6e8   :  { %350 = vrot.lane.b32.xlu0 %v1691_v1, %s1770_s1 }
 0x75a   :  { %v351_v2 = vpop.permute.xlu0 %350 }
 0x75b   :  { %v1914_v3 = vmul.f32 %v351_v2, %v335_v57 }
 0x75d   :  { %v362_v5 = vpack.c.bf16 %v1914_v3, %v1914_v3 }
 0x75f   :  { %364 = vrot.lane.b32.xlu1 %v362_v5, %s1774_s2 }
 0x7d1   :  { %v365_v11 = vpop.permute.xlu1 %364 }
 0x7d2   :  { %1555 = vmatmul.mubr.msk.bf16.vlgmr.msra.gmra.mrb[8].mxu0 %vm186_vm3, %v365_v11 }
 0x7d3   :  { %1567 = vmatpush3.bf16.msra.mxu0 %v1851_v18  ;;  %1570 = vmatprep.mubr.msk.bf16.mxu0 %vm1772_vm2, %v1771_v17 }
 0x7d4   :  { %1568 = vmatprep.subr.bf16.mxu0 %v1771_v17 }
 0x7d7   :  { %1569 = vmatpush3.bf16.msra.mxu0 %v1860_v19 }
 0x7d8   :  { %1582 = vmatprep.subr.bf16.mxu0 %v1771_v17 }
 0x8a5   :  { %v403_v13 = vpop.f32.mrb[8].mxu0 }
 0x8a6   :  { %v409_v14 = vadd.f32 %v403_v13, %v138_v12  ;;  %v1556_v15 = vpop.f32.mrb[9].mxu0 }
 0x8a7   :  { %v406_v16 = vpop.f32.mrb[10].mxu0  ;;  %v1670_v15 = vld [vmem:[%s2168_s4] sm:$0xff]  }
 0x8a8   :  { %1692 = vtanh.f32 %v409_v14  ;;  %v1557_v20 = vpop.f32.mrb[11].mxu0  ;;  %v410_v23 = vmul.f32 0.5, %v409_v14 }
 0x8aa   :  { %1694 = vtanh.f32 %v410_v23 }
 0x8b2   :  { %v1693_v21 = vpop.eup %1692 }
 0x8b3   :  { %417 = vrot.lane.b32.xlu0 %v1693_v21, %s1770_s1 }
 0x8b4   :  { %v1695_v24 = vpop.eup %1694 }
 0x8b5   :  { %v412_v25 = vadd.f32 1.0, %v1695_v24 }
 0x8b7   :  { %v413_v26 = vmul.f32 0.5, %v412_v25 }
 0x8b9   :  { %v415_v29 = vmul.f32 %v413_v26, %v347_v62 }
 0x925   :  { %v418_v27 = vpop.permute.xlu0 %417 }
 0x926   :  { %v420_v28 = vmul.f32 %v418_v27, %v413_v26 }
 0x928   :  { %422 = vrot.lane.b32.xlu1 %v420_v28, %s1774_s2 }
 0x99a   :  { %v423_v8 = vpop.permute.xlu1 %422 }
 0x99b   :  { %v425_v30 = vadd.f32 %v423_v8, %v415_v29 }
 0x99d   :  { %1696 = vtanh.f32 %v425_v30 }
 0x9a7   :  { %v1697_v31 = vpop.eup %1696 }
 0x9a8   :  { %428 = vrot.lane.b32.xlu0 %v1697_v31, %s1770_s1 }
 0xa1a   :  { %v429_v32 = vpop.permute.xlu0 %428 }
 0xa1b   :  { %v1937_v33 = vmul.f32 %v429_v32, %v413_v26 }
 0xa1d   :  { %v440_v34 = vpack.c.bf16 %v1937_v33, %v1937_v33 }
 0xa1f   :  { %442 = vrot.lane.b32.xlu1 %v440_v34, %s1774_s2 }
 0xa91   :  { %v443_v35 = vpop.permute.xlu1 %442 }
 0xa92   :  { %1563 = vmatmul.mubr.msk.bf16.vlgmr.msra.gmra.mrb[8].mxu1 %vm186_vm3, %v443_v35 }
 0xa93   :  { %1575 = vmatpush3.bf16.msra.mxu1 %v1851_v18  ;;  %1578 = vmatprep.mubr.msk.bf16.mxu1 %vm1772_vm2, %v1771_v17 }
 0xa94   :  { %1576 = vmatprep.subr.bf16.mxu1 %v1771_v17 }
 0xa97   :  { %1577 = vmatpush3.bf16.msra.mxu1 %v1860_v19 }
 0xa98   :  { %1590 = vmatprep.subr.bf16.mxu1 %v1670_v15 }
 0xb65   :  { %v481_v37 = vpop.f32.mrb[8].mxu1 }
 0xb66   :  { %v487_v38 = vadd.f32 %v481_v37, %v143_v36  ;;  %v1564_v39 = vpop.f32.mrb[9].mxu1  ;;  %v2005_v37 = vld [vmem:[%s2169_s6] ss:$0 sm:$0xff] }
 0xb67   :  { %v484_v40 = vpop.f32.mrb[10].mxu1 }
 0xb68   :  { %1698 = vtanh.f32 %v487_v38  ;;  %v1565_v41 = vpop.f32.mrb[11].mxu1  ;;  %v488_v43 = vmul.f32 0.5, %v487_v38 }
 0xb6a   :  { %1700 = vtanh.f32 %v488_v43 }
 0xb72   :  { %v1699_v42 = vpop.eup %1698 }
 0xb73   :  { %495 = vrot.lane.b32.xlu0 %v1699_v42, %s1770_s1 }
 0xb74   :  { %v1701_v45 = vpop.eup %1700 }
 0xb75   :  { %v490_v46 = vadd.f32 1.0, %v1701_v45 }
 0xb77   :  { %v491_v47 = vmul.f32 0.5, %v490_v46 }
 0xb79   :  { %v493_v50 = vmul.f32 %v491_v47, %v425_v30  ;;  %v151_v30 = vadd.f32 %v1919_v6, %v1839_v4 }
 0xbe5   :  { %v496_v48 = vpop.permute.xlu0 %495 }
 0xbe6   :  { %v498_v49 = vmul.f32 %v496_v48, %v491_v47 }
 0xbe8   :  { %500 = vrot.lane.b32.xlu1 %v498_v49, %s1774_s2 }
 0xc5a   :  { %v501_v51 = vpop.permute.xlu1 %500 }
 0xc5b   :  { %v503_v52 = vadd.f32 %v501_v51, %v493_v50 }
 0xc5d   :  { %1702 = vtanh.f32 %v503_v52 }
 0xc67   :  { %v1703_v53 = vpop.eup %1702 }
 0xc68   :  { %506 = vrot.lane.b32.xlu0 %v1703_v53, %s1770_s1 }
 0xcda   :  { %v507_v54 = vpop.permute.xlu0 %506 }
 0xcdb   :  { %v1952_v55 = vmul.f32 %v507_v54, %v491_v47 }
 0xcdd   :  { %v518_v56 = vpack.c.bf16 %v1952_v55, %v1952_v55 }
 0xcdf   :  { %520 = vrot.lane.b32.xlu1 %v518_v56, %s1774_s2 }
 0xd51   :  { %v521_v57 = vpop.permute.xlu1 %520 }
 0xd52   :  { %1571 = vmatmul.mubr.msk.bf16.vlgmr.msra.gmra.mrb[12].mxu0 %vm186_vm3, %v521_v57 }
 0xd53   :  { %1583 = vmatpush3.bf16.msra.mxu0 %v1851_v18  ;;  %1586 = vmatprep.mubr.msk.bf16.mxu0 %vm1772_vm2, %v1771_v17 }
 0xd54   :  { %1584 = vmatprep.subr.bf16.mxu0 %v1771_v17 }
 0xd57   :  { %1585 = vmatpush3.bf16.msra.mxu0 %v1860_v19 }
 0xd58   :  { %1602 = vmatprep.subr.bf16.mxu0 %v1771_v17 }
 0xe25   :  { %v559_v59 = vpop.f32.mrb[12].mxu0 }
 0xe26   :  { %v565_v60 = vadd.f32 %v559_v59, %v146_v58  ;;  %v1572_v61 = vpop.f32.mrb[13].mxu0 }
 0xe27   :  { %v562_v62 = vpop.f32.mrb[14].mxu0 }
 0xe28   :  { %1704 = vtanh.f32 %v565_v60  ;;  %v1573_v63 = vpop.f32.mrb[15].mxu0  ;;  %v566_v18 = vmul.f32 0.5, %v565_v60 }
 0xe2a   :  { %1706 = vtanh.f32 %v566_v18  ;;  %v2027_v18 = vld [vmem:[%s2170_s5] sm:$0xff]  }
 0xe32   :  { %v1705_v0 = vpop.eup %1704 }
 0xe33   :  { %573 = vrot.lane.b32.xlu0 %v1705_v0, %s1770_s1 }
 0xe34   :  { %v1707_v1 = vpop.eup %1706 }
 0xe35   :  { %v568_v2 = vadd.f32 1.0, %v1707_v1  ;;  %v2034_v1 = vld [vmem:[%s2170_s5 + $0x8] sm:$0xff]  }
 0xe37   :  { %v569_v5 = vmul.f32 0.5, %v568_v2 }
 0xe39   :  { %v571_v11 = vmul.f32 %v569_v5, %v503_v52 }
 0xea5   :  { %v574_v19 = vpop.permute.xlu0 %573 }
 0xea6   :  { %v576_v7 = vmul.f32 %v574_v19, %v569_v5 }
 0xea8   :  { %578 = vrot.lane.b32.xlu1 %v576_v7, %s1774_s2 }
 0xf1a   :  { %v579_v10 = vpop.permute.xlu1 %578 }
 0xf1b   :  { %v1968_v12 = vadd.f32 %v579_v10, %v571_v11  ;;  %v154_v10 = vadd.f32 %v1921_v9, %v1839_v4 }
 0xf1d   :  { %1708 = vtanh.f32 %v1968_v12 }
 0xf27   :  { %v1709_v13 = vpop.eup %1708 }
 0xf28   :  { %584 = vrot.lane.b32.xlu0 %v1709_v13, %s1770_s1 }
 0xf2c   :  { %183 = vrot.lane.b32.xlu0 %v1871_v22, %s1774_s2 }
 0xf30   :  { %355 = vrot.lane.b32.xlu0 %v1914_v3, %s1774_s2  ;;  %v1671_v3 = vld [vmem:[%s2168_s4 + $0x8] sm:$0xff]  }
 0xf9a   :  { %v585_v14 = vpop.permute.xlu0 %584 }
 0xf9b   :  { %v1979_v16 = vmul.f32 %v585_v14, %v569_v5 }
 0xf9d   :  { %v596_v20 = vpack.c.bf16 %v1979_v16, %v1979_v16 }
 0xf9e   :  { %v184_v21 = vpop.permute.xlu0 %183 }
 0xf9f   :  { %187 = vst.msk [vmem:[#allocation3] sm:$0xff] %vm186_vm3, %v184_v21  ;;  %598 = vrot.lane.b32.xlu1 %v596_v20, %s1774_s2 }
 0xfa2   :  { %v356_v22 = vpop.permute.xlu0 %355 }
 0xfa3   :  { %359 = vst.msk [vmem:[#allocation3 + $0x10] sm:$0xff] %vm186_vm3, %v356_v22  ;;  %277 = vrot.lane.b32.xlu1 %v1887_v44, %s1774_s2 }
 0xfa6   :  { %v750_v44 = vld [vmem:[#allocation3] sm:$0xff] }
 0xfa7   :  { %433 = vrot.lane.b32.xlu1 %v1937_v33, %s1774_s2 }
 0xfaa   :  { %v752_v28 = vld [vmem:[#allocation3 + $0x10] sm:$0xff] }
0x1011   :  { %v599_v23 = vpop.permute.xlu1 %598 }
0x1012   :  { %1579 = vmatmul.mubr.msk.bf16.vlgmr.msra.gmra.mrb[12].mxu1 %vm186_vm3, %v599_v23 }
0x1013   :  { %1591 = vmatpush3.bf16.msra.mxu1 %v1670_v15 }
0x1014   :  { %1592 = vmatprep.subr.bf16.mxu1 %v1671_v3 }
0x1015   :  { %v278_v24 = vpop.permute.xlu1 %277 }
0x1016   :  { %281 = vst.msk [vmem:[#allocation3 + $0x8] sm:$0xff] %vm186_vm3, %v278_v24 }
0x1017   :  { %1593 = vmatpush3.bf16.msra.mxu1 %v1671_v3 }
0x1018   :  { %1618 = vmatprep.subr.bf16.mxu1 %v1771_v17 }
0x1019   :  { %v434_v25 = vpop.permute.xlu1 %433 }
0x101a   :  { %437 = vst.msk [vmem:[#allocation3 + $0x18] sm:$0xff] %vm186_vm3, %v434_v25 }
0x101d   :  { %v751_v26 = vld [vmem:[#allocation3 + $0x8] sm:$0xff] }
0x101e   :  { %v767_v27 = vpack.c.bf16 %v751_v26, %v750_v44 }
0x1020   :  { %1594 = vmatprep.mubr.msk.bf16.mxu1 %vm186_vm3, %v767_v27 }
0x1021   :  { %v753_v29 = vld [vmem:[#allocation3 + $0x18] sm:$0xff] }
0x1022   :  { %v768_v8 = vpack.c.bf16 %v753_v29, %v752_v28 }
0x1024   :  { %1595 = vmatmul.mubr.msk.bf16.vlgmr.msra.gmra.mrb[16].mxu1 %vm186_vm3, %v768_v8 }
0x1025   :  { %1619 = vmatpush3.bf16.msra.mxu1 %v2027_v18 }
0x1026   :  { %1620 = vmatprep.subr.bf16.mxu1 %v1771_v17 }
0x1029   :  { %1621 = vmatpush3.bf16.msra.mxu1 %v2034_v1 }
0x102a   :  { %1634 = vmatprep.subr.bf16.mxu1 %v1771_v17 }
0x10e5   :  { %v637_v31 = vpop.f32.mrb[12].mxu1 }
0x10e6   :  { %v643_v32 = vadd.f32 %v637_v31, %v151_v30  ;;  %v1580_v33 = vpop.f32.mrb[13].mxu1 }
0x10e7   :  { %v640_v34 = vpop.f32.mrb[14].mxu1 }
0x10e8   :  { %1710 = vtanh.f32 %v643_v32  ;;  %v1581_v35 = vpop.f32.mrb[15].mxu1  ;;  %v644_v43 = vmul.f32 0.5, %v643_v32 }
0x10f2   :  { %v1711_v36 = vpop.eup %1710 }
0x10f3   :  { %651 = vrot.lane.b32.xlu0 %v1711_v36, %s1770_s1 }
0x10f7   :  { %v2007_v38 = vpop.f32.mrb[16].mxu1 }
0x10f8   :  { %v835_v39 = vpop.f32.mrb[17].mxu1 }
0x10f9   :  { %v836_v40 = vadd.f32 %v2005_v37, %v835_v39  ;;  %v2010_v6 = vpop.f32.mrb[18].mxu1 }
0x10fa   :  { %v2012_v41 = vpop.f32.mrb[19].mxu1 }
0x10fb   :  { %1712 = vtanh.f32 %v836_v40  ;;  %v875_v47 = vmul.f32 0.5, %v836_v40  ;;  %v839_v21 = vadd.f32 %v2005_v37, %v2012_v41 }
0x10fc   :  { %1714 = vtanh.f32 %v644_v43 }
0x10fd   :  { %1716 = vtanh.f32 %v875_v47 }
0x1105   :  { %v1713_v42 = vpop.eup %1712 }
0x1106   :  { %881 = vrot.lane.b32.xlu0 %v1713_v42, %s1770_s1  ;;  %v1715_v45 = vpop.eup %1714 }
0x1107   :  { %v646_v46 = vadd.f32 1.0, %v1715_v45  ;;  %v1717_v51 = vpop.eup %1716 }
0x1108   :  { %v877_v52 = vadd.f32 1.0, %v1717_v51 }
0x1109   :  { %v647_v48 = vmul.f32 0.5, %v646_v46 }
0x110a   :  { %v878_v53 = vmul.f32 0.5, %v877_v52 }
0x110b   :  { %v649_v58 = vmul.f32 %v647_v48, %v1968_v12 }
0x1165   :  { %v652_v49 = vpop.permute.xlu0 %651 }
0x1166   :  { %v654_v50 = vmul.f32 %v652_v49, %v647_v48 }
0x1168   :  { %656 = vrot.lane.b32.xlu1 %v654_v50, %s1774_s2 }
0x1178   :  { %v882_v54 = vpop.permute.xlu0 %881 }
0x1179   :  { %v884_v56 = vmul.f32 %v882_v54, %v878_v53 }
0x117b   :  { %1718 = vtanh.f32 %v884_v56 }
0x1185   :  { %v1719_v57 = vpop.eup %1718 }
0x1186   :  { %887 = vrot.lane.b32.xlu0 %v1719_v57, %s1773_s20 }
0x11da   :  { %v657_v59 = vpop.permute.xlu1 %656 }
0x11db   :  { %v2018_v60 = vadd.f32 %v657_v59, %v649_v58 }
0x11dd   :  { %1720 = vtanh.f32 %v2018_v60 }
0x11e7   :  { %v1721_v61 = vpop.eup %1720 }
0x11e8   :  { %662 = vrot.lane.b32.xlu1 %v1721_v61, %s1770_s1 }
0x11f8   :  { %v888_v62 = vpop.permute.xlu0 %887 }
0x11f9   :  { %v890_v63 = vmul.f32 %v888_v62, %v878_v53 }
0x11fb   :  { %v892_v0 = vpack.c.bf16 %v890_v63, %v890_v63 }
0x11fd   :  { %894 = vrot.lane.b32.xlu0 %v892_v0, %s1774_s2 }
0x1201   :  { %958 = vrot.lane.b32.xlu0 %v884_v56, %s1774_s2  ;;  %v844_v56 = vadd.f32 %v2007_v38, %v2005_v37 }
0x125a   :  { %v663_v2 = vpop.permute.xlu1 %662 }
0x125b   :  { %v2038_v5 = vmul.f32 %v663_v2, %v647_v48 }
0x125d   :  { %v674_v19 = vpack.c.bf16 %v2038_v5, %v2038_v5 }
0x125f   :  { %676 = vrot.lane.b32.xlu1 %v674_v19, %s1774_s2 }
0x126f   :  { %v895_v11 = vpop.permute.xlu0 %894 }
0x1273   :  { %v959_v8 = vpop.permute.xlu0 %958 }
0x12d1   :  { %v677_v7 = vpop.permute.xlu1 %676 }
0x12d2   :  { %1587 = vmatmul.mubr.msk.bf16.vlgmr.msra.gmra.mrb[16].mxu0 %vm186_vm3, %v677_v7 }
0x12d3   :  { %1603 = vmatpush3.bf16.msra.mxu0 %v2027_v18  ;;  %1606 = vmatprep.mubr.msk.bf16.mxu0 %vm1772_vm2, %v1771_v17 }
0x12d4   :  { %1604 = vmatprep.subr.bf16.mxu0 %v1771_v17 }
0x12d7   :  { %1605 = vmatpush3.bf16.msra.mxu0 %v2034_v1 }
0x12d8   :  { %1610 = vmatprep.subr.bf16.mxu0 %v1771_v17 }
0x12da   :  { %1607 = vmatmul.mubr.msk.bf16.vlgmr.msra.gmra.mrb[20].mxu0 %vm186_vm3, %v895_v11 }
0x12db   :  { %1611 = vmatpush3.bf16.msra.mxu0 %v2027_v18  ;;  %1614 = vmatprep.mubr.msk.bf16.mxu0 %vm1772_vm2, %v1771_v17 }
0x12dc   :  { %1612 = vmatprep.subr.bf16.mxu0 %v1771_v17 }
0x12df   :  { %1613 = vmatpush3.bf16.msra.mxu0 %v2034_v1 }
0x12e0   :  { %1626 = vmatprep.subr.bf16.mxu0 %v1771_v17 }
0x13a5   :  { %v715_v12 = vpop.f32.mrb[16].mxu0 }
0x13a6   :  { %v721_v13 = vadd.f32 %v715_v12, %v154_v10  ;;  %v1588_v14 = vpop.f32.mrb[17].mxu0 }
0x13a7   :  { %v718_v15 = vpop.f32.mrb[18].mxu0 }
0x13a8   :  { %v1589_v20 = vpop.f32.mrb[19].mxu0  ;;  %v722_v35 = vmul.f32 0.5, %v721_v13 }
0x13ad   :  { %v945_v22 = vpop.f32.mrb[20].mxu0 }
0x13ae   :  { %v951_v3 = vadd.f32 %v945_v22, %v839_v21  ;;  %v1608_v23 = vpop.f32.mrb[21].mxu0 }
0x13af   :  { %v948_v24 = vpop.f32.mrb[22].mxu0 }
0x13b0   :  { %1722 = vtanh.f32 %v951_v3  ;;  %v1609_v25 = vpop.f32.mrb[23].mxu0  ;;  %v952_v26 = vmul.f32 0.5, %v951_v3 }
0x13b2   :  { %1724 = vtanh.f32 %v952_v26 }
0x13ba   :  { %v1723_v44 = vpop.eup %1722 }
0x13bb   :  { %963 = vrot.lane.b32.xlu1 %v1723_v44, %s1770_s1 }
0x13bc   :  { %v1725_v4 = vpop.eup %1724 }
0x13bd   :  { %v954_v9 = vadd.f32 1.0, %v1725_v4 }
0x13bf   :  { %v955_v27 = vmul.f32 0.5, %v954_v9 }
0x13c1   :  { %v961_v30 = vmul.f32 %v959_v8, %v955_v27 }
0x142d   :  { %v964_v28 = vpop.permute.xlu1 %963 }
0x142e   :  { %v966_v29 = vmul.f32 %v964_v28, %v955_v27  ;;  %v847_v28 = vadd.f32 %v2010_v6, %v2005_v37 }
0x1430   :  { %968 = vrot.lane.b32.xlu1 %v966_v29, %s1774_s2 }
0x14a2   :  { %v969_v31 = vpop.permute.xlu1 %968 }
0x14a3   :  { %v971_v32 = vadd.f32 %v969_v31, %v961_v30 }
0x14a5   :  { %1726 = vtanh.f32 %v971_v32 }
0x14a6   :  { %1728 = vtanh.f32 %v721_v13 }
0x14a7   :  { %1730 = vtanh.f32 %v722_v35 }
0x14af   :  { %v1727_v33 = vpop.eup %1726 }
0x14b0   :  { %974 = vrot.lane.b32.xlu0 %v1727_v33, %s1770_s1  ;;  %v1729_v34 = vpop.eup %1728 }
0x14b1   :  { %v1731_v36 = vpop.eup %1730 }
0x14b2   :  { %v724_v39 = vadd.f32 1.0, %v1731_v36 }
0x14b4   :  { %729 = vrot.lane.b32.xlu0 %v1729_v34, %s1770_s1  ;;  %v725_v43 = vmul.f32 0.5, %v724_v39 }
0x14b6   :  { %v727_v48 = vmul.f32 %v725_v43, %v2018_v60 }
0x1522   :  { %v975_v40 = vpop.permute.xlu0 %974 }
0x1523   :  { %v977_v41 = vmul.f32 %v975_v40, %v955_v27 }
0x1525   :  { %v979_v42 = vpack.c.bf16 %v977_v41, %v977_v41 }
0x1526   :  { %v730_v45 = vpop.permute.xlu0 %729 }
0x1527   :  { %v732_v46 = vmul.f32 %v730_v45, %v725_v43  ;;  %981 = vrot.lane.b32.xlu1 %v979_v42, %s1774_s2 }
0x1529   :  { %734 = vrot.lane.b32.xlu0 %v732_v46, %s1774_s2 }
0x1599   :  { %v982_v47 = vpop.permute.xlu1 %981 }
0x159a   :  { %1615 = vmatmul.mubr.msk.bf16.vlgmr.msra.gmra.mrb[24].mxu0 %vm186_vm3, %v982_v47 }
0x159b   :  { %v735_v49 = vpop.permute.xlu0 %734  ;;  %1627 = vmatpush3.bf16.msra.mxu0 %v2027_v18  ;;  %1630 = vmatprep.mubr.msk.bf16.mxu0 %vm1772_vm2, %v1771_v17 }
0x159c   :  { %v737_v50 = vadd.f32 %v735_v49, %v727_v48  ;;  %1628 = vmatprep.subr.bf16.mxu0 %v1771_v17 }
0x159e   :  { %1732 = vtanh.f32 %v737_v50 }
0x159f   :  { %1629 = vmatpush3.bf16.msra.mxu0 %v2034_v1 }
0x15a0   :  { %1642 = vmatprep.subr.bf16.mxu0 %v1771_v17 }
0x15a8   :  { %v1733_v51 = vpop.eup %1732 }
0x15a9   :  { %740 = vrot.lane.b32.xlu0 %v1733_v51, %s1770_s1 }
0x15ad   :  { %511 = vrot.lane.b32.xlu0 %v1952_v55, %s1774_s2 }
0x15b1   :  { %667 = vrot.lane.b32.xlu0 %v2038_v5, %s1774_s2 }
0x161b   :  { %v741_v52 = vpop.permute.xlu0 %740 }
0x161c   :  { %v743_v12 = vmul.f32 %v741_v52, %v725_v43 }
0x161f   :  { %v512_v53 = vpop.permute.xlu0 %511 }
0x1620   :  { %515 = vst.msk [vmem:[#allocation3 + $0x20] sm:$0xff] %vm186_vm3, %v512_v53 }
0x1623   :  { %v668_v54 = vpop.permute.xlu0 %667 }
0x1624   :  { %671 = vst.msk [vmem:[#allocation3 + $0x30] sm:$0xff] %vm186_vm3, %v668_v54 }
0x1627   :  { %v754_v22 = vld [vmem:[#allocation3 + $0x20] sm:$0xff] }
0x166d   :  { %v1020_v57 = vpop.f32.mrb[24].mxu0 }
0x166e   :  { %v1026_v58 = vadd.f32 %v1020_v57, %v844_v56  ;;  %v1616_v59 = vpop.f32.mrb[25].mxu0 }
0x166f   :  { %v1023_v60 = vpop.f32.mrb[26].mxu0 }
0x1670   :  { %1734 = vtanh.f32 %v1026_v58  ;;  %v1617_v61 = vpop.f32.mrb[27].mxu0  ;;  %v1027_v62 = vmul.f32 0.5, %v1026_v58 }
0x1672   :  { %1736 = vtanh.f32 %v1027_v62 }
0x167a   :  { %v1735_v55 = vpop.eup %1734 }
0x167b   :  { %1034 = vrot.lane.b32.xlu1 %v1735_v55, %s1770_s1 }
0x167c   :  { %v1737_v63 = vpop.eup %1736 }
0x167d   :  { %v1029_v0 = vadd.f32 1.0, %v1737_v63 }
0x167f   :  { %v1030_v2 = vmul.f32 0.5, %v1029_v0 }
0x1681   :  { %v1032_v7 = vmul.f32 %v1030_v2, %v971_v32 }
0x16ed   :  { %v1035_v5 = vpop.permute.xlu1 %1034 }
0x16ee   :  { %v1037_v19 = vmul.f32 %v1035_v5, %v1030_v2 }
0x16f0   :  { %1039 = vrot.lane.b32.xlu1 %v1037_v19, %s1774_s2 }
0x1762   :  { %v1040_v38 = vpop.permute.xlu1 %1039 }
0x1763   :  { %v1042_v11 = vadd.f32 %v1040_v38, %v1032_v7 }
0x1765   :  { %1738 = vtanh.f32 %v1042_v11 }
0x176f   :  { %v1739_v10 = vpop.eup %1738 }
0x1770   :  { %1045 = vrot.lane.b32.xlu1 %v1739_v10, %s1770_s1 }
0x1774   :  { %589 = vrot.lane.b32.xlu1 %v1979_v16, %s1774_s2  ;;  %v756_v16 = vld [vmem:[#allocation3 + $0x30] sm:$0xff] }
0x1778   :  { %745 = vrot.lane.b32.xlu1 %v743_v12, %s1774_s2 }
0x17e2   :  { %v1046_v13 = vpop.permute.xlu1 %1045 }
0x17e3   :  { %v1048_v14 = vmul.f32 %v1046_v13, %v1030_v2 }
0x17e5   :  { %v1050_v15 = vpack.c.bf16 %v1048_v14, %v1048_v14 }
0x17e6   :  { %v590_v20 = vpop.permute.xlu1 %589 }
0x17e7   :  { %593 = vst.msk [vmem:[#allocation3 + $0x28] sm:$0xff] %vm186_vm3, %v590_v20  ;;  %1052 = vrot.lane.b32.xlu0 %v1050_v15, %s1774_s2 }
0x17ea   :  { %v746_v21 = vpop.permute.xlu1 %745 }
0x17eb   :  { %749 = vst.msk [vmem:[#allocation3 + $0x38] sm:$0xff] %vm186_vm3, %v746_v21 }
0x17ee   :  { %v755_v3 = vld [vmem:[#allocation3 + $0x28] sm:$0xff] }
0x17ef   :  { %v769_v23 = vpack.c.bf16 %v755_v3, %v754_v22 }
0x17f1   :  { %1598 = vmatprep.mubr.msk.bf16.mxu1 %vm186_vm3, %v769_v23 }
0x17f2   :  { %v757_v24 = vld [vmem:[#allocation3 + $0x38] sm:$0xff] }
0x17f3   :  { %v770_v25 = vpack.c.bf16 %v757_v24, %v756_v16 }
0x17f5   :  { %1599 = vmatmul.mubr.msk.bf16.gmra.mrb[20].mxu1 %vm186_vm3, %v770_v25 }
0x17f6   :  { %1622 = vmatprep.mubr.msk.bf16.mxu1 %vm1772_vm2, %v1771_v17 }
0x1859   :  { %v1053_v44 = vpop.permute.xlu0 %1052 }
0x185a   :  { %1623 = vmatmul.mubr.msk.bf16.vlgmr.msra.gmra.mrb[24].mxu1 %vm186_vm3, %v1053_v44 }
0x185b   :  { %1635 = vmatpush3.bf16.msra.mxu1 %v2027_v18  ;;  %1638 = vmatprep.mubr.msk.bf16.mxu1 %vm1772_vm2, %v1771_v17 }
0x185c   :  { %1636 = vmatprep.subr.bf16.mxu1 %v1771_v17 }
0x185f   :  { %1637 = vmatpush3.bf16.msra.mxu1 %v2034_v1 }
0x1860   :  { %1650 = vmatprep.subr.bf16.mxu1 %v1771_v17 }
0x18c8   :  { %v2104_v26 = vpop.f32.mrb[20].mxu1 }
0x18c9   :  { %v851_v4 = vpop.f32.mrb[21].mxu1 }
0x18ca   :  { %v2106_v9 = vpop.f32.mrb[22].mxu1  ;;  %v852_v50 = vadd.f32 %v2005_v37, %v851_v4 }
0x18cb   :  { %v2108_v27 = vpop.f32.mrb[23].mxu1 }
0x18cc   :  { %v855_v10 = vadd.f32 %v2005_v37, %v2108_v27 }
0x192d   :  { %v1091_v29 = vpop.f32.mrb[24].mxu1 }
0x192e   :  { %v1097_v8 = vadd.f32 %v1091_v29, %v847_v28  ;;  %v1624_v30 = vpop.f32.mrb[25].mxu1 }
0x192f   :  { %v1094_v31 = vpop.f32.mrb[26].mxu1 }
0x1930   :  { %1740 = vtanh.f32 %v1097_v8  ;;  %v1625_v32 = vpop.f32.mrb[27].mxu1  ;;  %v1098_v34 = vmul.f32 0.5, %v1097_v8  ;;  %v860_v8 = vadd.f32 %v2104_v26, %v2005_v37 }
0x1932   :  { %1742 = vtanh.f32 %v1098_v34 }
0x193a   :  { %v1741_v33 = vpop.eup %1740 }
0x193b   :  { %1105 = vrot.lane.b32.xlu1 %v1741_v33, %s1770_s1 }
0x193c   :  { %v1743_v35 = vpop.eup %1742 }
0x193d   :  { %v1100_v36 = vadd.f32 1.0, %v1743_v35 }
0x193f   :  { %v1101_v39 = vmul.f32 0.5, %v1100_v36 }
0x1941   :  { %v1103_v42 = vmul.f32 %v1101_v39, %v1042_v11 }
0x19ad   :  { %v1106_v40 = vpop.permute.xlu1 %1105 }
0x19ae   :  { %v1108_v41 = vmul.f32 %v1106_v40, %v1101_v39 }
0x19b0   :  { %1110 = vrot.lane.b32.xlu0 %v1108_v41, %s1774_s2 }
0x1a22   :  { %v1111_v6 = vpop.permute.xlu0 %1110 }
0x1a23   :  { %v1113_v43 = vadd.f32 %v1111_v6, %v1103_v42 }
0x1a25   :  { %1744 = vtanh.f32 %v1113_v43 }
0x1a2f   :  { %v1745_v45 = vpop.eup %1744 }
0x1a30   :  { %1116 = vrot.lane.b32.xlu1 %v1745_v45, %s1770_s1 }
0x1aa2   :  { %v1117_v46 = vpop.permute.xlu1 %1116 }
0x1aa3   :  { %v1119_v47 = vmul.f32 %v1117_v46, %v1101_v39 }
0x1aa5   :  { %v1121_v48 = vpack.c.bf16 %v1119_v47, %v1119_v47 }
0x1aa7   :  { %1123 = vrot.lane.b32.xlu0 %v1121_v48, %s1774_s2 }
0x1b19   :  { %v1124_v49 = vpop.permute.xlu0 %1123 }
0x1b1a   :  { %1631 = vmatmul.mubr.msk.bf16.vlgmr.msra.gmra.mrb[28].mxu0 %vm186_vm3, %v1124_v49 }
0x1b1b   :  { %1643 = vmatpush3.bf16.msra.mxu0 %v2027_v18  ;;  %1646 = vmatprep.mubr.msk.bf16.mxu0 %vm1772_vm2, %v1771_v17 }
0x1b1c   :  { %1644 = vmatprep.subr.bf16.mxu0 %v1771_v17 }
0x1b1f   :  { %1645 = vmatpush3.bf16.msra.mxu0 %v2034_v1 }
0x1bed   :  { %v1162_v51 = vpop.f32.mrb[28].mxu0 }
0x1bee   :  { %v1168_v52 = vadd.f32 %v1162_v51, %v852_v50  ;;  %v1632_v53 = vpop.f32.mrb[29].mxu0  ;;  %v863_v51 = vadd.f32 %v2106_v9, %v2005_v37  ;;  %v1469_v37 = vld [vmem:[%s2171_s7] ss:$0 sm:$0xff] }
0x1bef   :  { %v1165_v54 = vpop.f32.mrb[30].mxu0 }
0x1bf0   :  { %1746 = vtanh.f32 %v1168_v52  ;;  %v1633_v56 = vpop.f32.mrb[31].mxu0  ;;  %v1169_v58 = vmul.f32 0.5, %v1168_v52 }
0x1bf2   :  { %1748 = vtanh.f32 %v1169_v58 }
0x1bfa   :  { %v1747_v57 = vpop.eup %1746 }
0x1bfb   :  { %1176 = vrot.lane.b32.xlu1 %v1747_v57, %s1770_s1 }
0x1bfc   :  { %v1749_v59 = vpop.eup %1748 }
0x1bfd   :  { %v1171_v60 = vadd.f32 1.0, %v1749_v59 }
0x1bff   :  { %v1172_v61 = vmul.f32 0.5, %v1171_v60 }
0x1c01   :  { %v1174_v63 = vmul.f32 %v1172_v61, %v1113_v43 }
0x1c6d   :  { %v1177_v55 = vpop.permute.xlu1 %1176 }
0x1c6e   :  { %v1179_v62 = vmul.f32 %v1177_v55, %v1172_v61 }
0x1c70   :  { %1181 = vrot.lane.b32.xlu0 %v1179_v62, %s1774_s2 }
0x1ce2   :  { %v1182_v0 = vpop.permute.xlu0 %1181 }
0x1ce3   :  { %v1184_v2 = vadd.f32 %v1182_v0, %v1174_v63 }
0x1ce5   :  { %1750 = vtanh.f32 %v1184_v2 }
0x1cef   :  { %v1751_v5 = vpop.eup %1750 }
0x1cf0   :  { %1187 = vrot.lane.b32.xlu1 %v1751_v5, %s1770_s1 }
0x1d62   :  { %v1188_v19 = vpop.permute.xlu1 %1187 }
0x1d63   :  { %v1190_v7 = vmul.f32 %v1188_v19, %v1172_v61  ;;  %v14_v19 = vstv %s2172_s8 }
0x1d64   :  { %15 = vst [vmem:[#allocation4] sm:$0x1] %v14_v19 }
0x1d65   :  { %v1192_v38 = vpack.c.bf16 %v1190_v7, %v1190_v7 }
0x1d67   :  { %1194 = vrot.lane.b32.xlu0 %v1192_v38, %s1774_s2 }
0x1dd9   :  { %v1195_v11 = vpop.permute.xlu0 %1194 }
0x1dda   :  { %1639 = vmatmul.mubr.msk.bf16.vlgmr.msra.gmra.mrb[28].mxu1 %vm186_vm3, %v1195_v11 }
0x1ddb   :  { %1651 = vmatpush3.bf16.msra.mxu1 %v2027_v18  ;;  %1654 = vmatprep.mubr.msk.bf16.mxu1 %vm1772_vm2, %v1771_v17 }
0x1ddc   :  { %1652 = vmatprep.subr.bf16.mxu1 %v1771_v17 }
0x1ddf   :  { %1653 = vmatpush3.bf16.msra.mxu1 %v2034_v1 }
0x1ead   :  { %v1233_v12 = vpop.f32.mrb[28].mxu1 }
0x1eae   :  { %v1239_v13 = vadd.f32 %v1233_v12, %v855_v10  ;;  %v1640_v14 = vpop.f32.mrb[29].mxu1 }
0x1eaf   :  { %v1236_v15 = vpop.f32.mrb[30].mxu1  ;;  %v1470_v14 = vld [vmem:[#allocation4] ss:$0 sm:$0xff] }
0x1eb0   :  { %1752 = vtanh.f32 %v1239_v13  ;;  %v1641_v20 = vpop.f32.mrb[31].mxu1  ;;  %v1240_v18 = vmul.f32 0.5, %v1239_v13 }
0x1eb2   :  { %1754 = vtanh.f32 %v1240_v18 }
0x1eba   :  { %v1753_v21 = vpop.eup %1752 }
0x1ebb   :  { %1247 = vrot.lane.b32.xlu1 %v1753_v21, %s1770_s1 }
0x1ebc   :  { %v1755_v22 = vpop.eup %1754 }
0x1ebd   :  { %v1242_v3 = vadd.f32 1.0, %v1755_v22 }
0x1ebf   :  { %v1243_v23 = vmul.f32 0.5, %v1242_v3 }
0x1ec1   :  { %v1245_v1 = vmul.f32 %v1243_v23, %v1184_v2 }
0x1f2d   :  { %v1248_v17 = vpop.permute.xlu1 %1247 }
0x1f2e   :  { %v1250_v16 = vmul.f32 %v1248_v17, %v1243_v23 }
0x1f30   :  { %1252 = vrot.lane.b32.xlu0 %v1250_v16, %s1774_s2 }
0x1fa2   :  { %v1253_v24 = vpop.permute.xlu0 %1252 }
0x1fa3   :  { %v1255_v25 = vadd.f32 %v1253_v24, %v1245_v1 }
0x1fa5   :  { %1756 = vtanh.f32 %v1255_v25 }
0x1faf   :  { %v1757_v44 = vpop.eup %1756 }
0x1fb0   :  { %1258 = vrot.lane.b32.xlu1 %v1757_v44, %s1770_s1 }
0x2022   :  { %v1259_v4 = vpop.permute.xlu1 %1258 }
0x2023   :  { %v1261_v27 = vmul.f32 %v1259_v4, %v1243_v23 }
0x2025   :  { %v1263_v28 = vpack.c.bf16 %v1261_v27, %v1261_v27 }
0x2027   :  { %1265 = vrot.lane.b32.xlu0 %v1263_v28, %s1774_s2 }
0x2099   :  { %v1266_v29 = vpop.permute.xlu0 %1265 }
0x209a   :  { %1647 = vmatmul.mubr.msk.bf16.vlgmr.msra.gmra.mrb[32].mxu0 %vm186_vm3, %v1266_v29 }
0x216d   :  { %v1304_v30 = vpop.f32.mrb[32].mxu0 }
0x216e   :  { %v1310_v31 = vadd.f32 %v1304_v30, %v860_v8  ;;  %v1648_v32 = vpop.f32.mrb[33].mxu0 }
0x216f   :  { %v1307_v33 = vpop.f32.mrb[34].mxu0 }
0x2170   :  { %1758 = vtanh.f32 %v1310_v31  ;;  %v1649_v34 = vpop.f32.mrb[35].mxu0  ;;  %v1311_v36 = vmul.f32 0.5, %v1310_v31 }
0x2172   :  { %1760 = vtanh.f32 %v1311_v36 }
0x217a   :  { %v1759_v35 = vpop.eup %1758 }
0x217b   :  { %1318 = vrot.lane.b32.xlu1 %v1759_v35, %s1770_s1 }
0x217c   :  { %v1761_v39 = vpop.eup %1760 }
0x217d   :  { %v1313_v40 = vadd.f32 1.0, %v1761_v39 }
0x217f   :  { %v1314_v41 = vmul.f32 0.5, %v1313_v40 }
0x2181   :  { %v1316_v43 = vmul.f32 %v1314_v41, %v1255_v25 }
0x21ed   :  { %v1319_v42 = vpop.permute.xlu1 %1318 }
0x21ee   :  { %v1321_v6 = vmul.f32 %v1319_v42, %v1314_v41 }
0x21f0   :  { %1323 = vrot.lane.b32.xlu0 %v1321_v6, %s1774_s2 }
0x2262   :  { %v1324_v26 = vpop.permute.xlu0 %1323 }
0x2263   :  { %v1326_v45 = vadd.f32 %v1324_v26, %v1316_v43 }
0x2265   :  { %1762 = vtanh.f32 %v1326_v45 }
0x226f   :  { %v1763_v46 = vpop.eup %1762 }
0x2270   :  { %1329 = vrot.lane.b32.xlu1 %v1763_v46, %s1770_s1 }
0x22e2   :  { %v1330_v47 = vpop.permute.xlu1 %1329 }
0x22e3   :  { %v1332_v48 = vmul.f32 %v1330_v47, %v1314_v41 }
0x22e5   :  { %v1334_v49 = vpack.c.bf16 %v1332_v48, %v1332_v48 }
0x22e7   :  { %1336 = vrot.lane.b32.xlu0 %v1334_v49, %s1774_s2 }
0x2359   :  { %v1337_v50 = vpop.permute.xlu0 %1336 }
0x235a   :  { %1655 = vmatmul.mubr.msk.bf16.vlgmr.msra.gmra.mrb[32].mxu1 %vm186_vm3, %v1337_v50 }
0x242d   :  { %v1375_v52 = vpop.f32.mrb[32].mxu1 }
0x242e   :  { %v1381_v53 = vadd.f32 %v1375_v52, %v863_v51  ;;  %v1656_v54 = vpop.f32.mrb[33].mxu1 }
0x242f   :  { %v1378_v56 = vpop.f32.mrb[34].mxu1 }
0x2430   :  { %1764 = vtanh.f32 %v1381_v53  ;;  %v1657_v57 = vpop.f32.mrb[35].mxu1  ;;  %v1382_v59 = vmul.f32 0.5, %v1381_v53 }
0x2432   :  { %1766 = vtanh.f32 %v1382_v59 }
0x243a   :  { %v1765_v58 = vpop.eup %1764 }
0x243b   :  { %1389 = vrot.lane.b32.xlu1 %v1765_v58, %s1770_s1 }
0x243c   :  { %v1767_v60 = vpop.eup %1766 }
0x243d   :  { %v1384_v61 = vadd.f32 1.0, %v1767_v60 }
0x243f   :  { %v1385_v55 = vmul.f32 0.5, %v1384_v61 }
0x2441   :  { %v1387_v9 = vmul.f32 %v1385_v55, %v1326_v45 }
0x24ad   :  { %v1390_v62 = vpop.permute.xlu1 %1389 }
0x24ae   :  { %v1392_v63 = vmul.f32 %v1390_v62, %v1385_v55 }
0x24b0   :  { %1394 = vrot.lane.b32.xlu0 %v1392_v63, %s1774_s2 }
0x24b4   :  { %1410 = vrot.lane.b32.xlu0 %v1469_v37, %s1773_s20 }
0x2522   :  { %v1395_v0 = vpop.permute.xlu0 %1394 }
0x2523   :  { %v1397_v2 = vadd.f32 %v1395_v0, %v1387_v9 }
0x2525   :  { %1768 = vtanh.f32 %v1397_v2 }
0x2526   :  { %v1411_v38 = vpop.permute.xlu0 %1410 }
0x252f   :  { %v1769_v5 = vpop.eup %1768 }
0x2530   :  { %1400 = vrot.lane.b32.xlu1 %v1769_v5, %s1770_s1 }
0x25a2   :  { %v1401_v7 = vpop.permute.xlu1 %1400 }
0x25a3   :  { %v1403_v11 = vmul.f32 %v1401_v7, %v1385_v55 }
0x25a5   :  { %v1413_v10 = vmul.f32 %v1411_v38, %v1403_v11 }
0x25a7   :  { %1415 = vrot.lane.b32.xlu1 %v1413_v10, %s1774_s2 }
0x2619   :  { %v1416_v12 = vpop.permute.xlu1 %1415 }
0x261a   :  { %v1418_v13 = vsel %vm186_vm3, %v1416_v12, 0.0 }
0x261b   :  { %1419 = vadd.xlane.f32.xlu0 %v1418_v13 }
0x26a8   :  { %v1420_v15 = vpop.xlane.xlu0 %1419 }
0x26a9   :  { %v1428_v20 = vadd.f32 %v1470_v14, %v1420_v15 }
0x26ab   :  { %1430 = vst.msk [vmem:[%s2173_s9] sm:$0xff] %vm1429_vm4, %v1428_v20 }

</bundles_post_ra>
